<compile_context>
chip_gen: v7x
topology: tpu7x:2x2x1
jax: 0.10.0
libtpu: 0.0.40
codegen_flags: <defaults>
</compile_context>

<pallas_src>
import jax
import jax.numpy as jnp
from jax import lax
from jax.experimental import pallas as pl
from jax.experimental.pallas import tpu as pltpu

BN_EPS = 1e-5


def _pose_kernel(x_ref, w_ref, scale_ref, bias_ref, o_ref):
    # x_ref:     (1, A, S)   zero-padded input for one image, spatial flattened
    # w_ref:     (TC, A)     1x1 conv weight tile
    # scale_ref: (TC, 1)     fused BN scale = gamma * rsqrt(var + eps)
    # bias_ref:  (TC, 1)     fused BN bias  = beta - mean * scale
    # o_ref:     (1, TC, S)  normalized pose tile (lane-dense on S)
    y = jnp.dot(w_ref[...], x_ref[0], preferred_element_type=jnp.float32)  # (TC, S)
    o_ref[0] = (y * scale_ref[...] + bias_ref[...]).astype(o_ref.dtype)


def _choose_channel_tile(C, A, S, vmem_budget=12 * 1024 * 1024):
    """Largest channel tile whose double-buffered f32 blocks fit the budget."""
    def blk_bytes(tc):
        # input (A,S) + output (tc,S) + weight (tc,A) + scale/bias, x2 buffers
        return 2 * (A * S + tc * S + tc * A + 2 * tc) * 4

    tc = C
    while tc > 8 and blk_bytes(tc) > vmem_budget:
        nxt = tc // 2
        if C % nxt != 0 or nxt % 8 != 0:
            break
        tc = nxt
    return tc


def primary_caps_forward(x_nchw, conv_w, bn_gamma, bn_beta, pad=1, out_dtype=None):
    """x_nchw: (N, A, H, W); conv_w: (C, A, 1, 1); returns (N, C, H+2p, W+2p).

    out_dtype: keep default (float32) to match PyTorch; pass jnp.bfloat16 to
    halve the (dominant) output writeback if downstream tolerates bf16 poses.
    """
    N, A, H, W = x_nchw.shape
    C = conv_w.shape[0]
    Ho, Wo = H + 2 * pad, W + 2 * pad
    S = Ho * Wo
    out_dtype = jnp.float32 if out_dtype is None else out_dtype

    x32 = x_nchw if x_nchw.dtype == jnp.float32 else x_nchw.astype(jnp.float32)
    w2d = conv_w.reshape(C, A)
    w2d = w2d if w2d.dtype == jnp.float32 else w2d.astype(jnp.float32)

    # ---- batch statistics via the (centered) gram identity: tiny XLA work ----
    # mu_x is the per-input-channel mean over all N*Ho*Wo padded positions
    # (border pixels are zero, so the unpadded sum suffices; only the divisor
    # counts them).  Centering x centers y, so the variance below is the
    # two-pass centered variance, not E[y^2]-mean^2 (no catastrophic cancel).
    count = jnp.float32(N * S)
    mu_x = jnp.sum(x32, axis=(0, 2, 3)) / count                     # (A,)
    xc = x32 - mu_x[None, :, None, None]
    G = jnp.einsum('nahw,nbhw->ab', xc, xc)                         # (A, A)
    n_border = count - jnp.float32(N * H * W)
    G = G + n_border * jnp.outer(mu_x, mu_x)                        # border pixels: (0-mu)(0-mu)^T

    mean_y = w2d @ mu_x                                             # (C,)
    var_y = jnp.einsum('ca,ab,cb->c', w2d, G, w2d) / count          # (C,)
    var_y = jnp.maximum(var_y, 0.0)
    inv_std = lax.rsqrt(var_y + BN_EPS)
    scale = bn_gamma.astype(jnp.float32) * inv_std                  # (C,)
    bias = bn_beta.astype(jnp.float32) - mean_y * scale             # (C,)
    scale = scale.reshape(C, 1)
    bias = bias.reshape(C, 1)

    # Zero-pad spatially and flatten spatial onto one lane-dense axis.  NCHW
    # is preserved, so the final reshape back to (N, C, Ho, Wo) is free.  The
    # pad copy touches only the A-channel input (~1/16 of the output bytes).
    x_flat = jnp.pad(x32, ((0, 0), (0, 0), (pad, pad), (pad, pad))).reshape(N, A, S)

    # ------ single writeback-bound pass: conv tile + fused y*scale + bias ------
    TC = _choose_channel_tile(C, A, S)
    # NOTE: for very large spatial sizes (blocks over budget even at TC=8) an
    # S-tile grid axis with 128-multiple tiles would be the next step; not
    # needed at these shapes.

    if TC == C:
        grid = (N,)
        in_specs = [
            pl.BlockSpec((1, A, S), lambda n: (n, 0, 0)),
            pl.BlockSpec((C, A), lambda n: (0, 0)),
            pl.BlockSpec((C, 1), lambda n: (0, 0)),
            pl.BlockSpec((C, 1), lambda n: (0, 0)),
        ]
        out_specs = pl.BlockSpec((1, C, S), lambda n: (n, 0, 0))
        dims = ("parallel",)
    else:
        grid = (N, C // TC)
        in_specs = [
            pl.BlockSpec((1, A, S), lambda n, c: (n, 0, 0)),
            pl.BlockSpec((TC, A), lambda n, c: (c, 0)),
            pl.BlockSpec((TC, 1), lambda n, c: (c, 0)),
            pl.BlockSpec((TC, 1), lambda n, c: (c, 0)),
        ]
        out_specs = pl.BlockSpec((1, TC, S), lambda n, c: (n, c, 0))
        dims = ("parallel", "parallel")

    est_vmem = 2 * (A * S + TC * S + TC * A + 2 * TC) * 4
    cp_kwargs = dict(dimension_semantics=dims)
    if est_vmem > 12 * 1024 * 1024:
        # Only needed when blocks outgrow the default scoped VMEM (16 MiB on
        # v5e); stays well under the 64 MiB physical VMEM of v7x.
        cp_kwargs["vmem_limit_bytes"] = min(int(est_vmem * 5 // 4), 48 * 1024 * 1024)

    out = pl.pallas_call(
        _pose_kernel,
        out_shape=jax.ShapeDtypeStruct((N, C, S), out_dtype),
        grid=grid,
        in_specs=in_specs,
        out_specs=out_specs,
        compiler_params=pltpu.CompilerParams(**cp_kwargs),
    )(x_flat, w2d, scale, bias)

    return out.reshape(N, C, Ho, Wo)


def _reference(x_nchw, conv_w, bn_gamma, bn_beta, pad=1):
    # Pure-JAX reference of the same forward (1x1 conv + training-mode BN).
    N, A, H, W = x_nchw.shape
    C = conv_w.shape[0]
    x_pad = jnp.pad(x_nchw, ((0, 0), (0, 0), (pad, pad), (pad, pad)))
    y = jnp.einsum('nahw,ca->nchw', x_pad, conv_w.reshape(C, A))
    mean = jnp.mean(y, axis=(0, 2, 3), keepdims=True)
    var = jnp.mean((y - mean) ** 2, axis=(0, 2, 3), keepdims=True)
    return (y - mean) / jnp.sqrt(var + BN_EPS) * bn_gamma.reshape(1, C, 1, 1) \
        + bn_beta.reshape(1, C, 1, 1)


if __name__ == "__main__":
    # Module hyper-params (defaults of PrimaryCaps: A=32, B=32, K=1, P=4).
    A, B, K, P, stride, pad = 32, 32, 1, 4, 1, 1
    C = B * P * P                      # 512 output channels
    N, H, W = 2, 16, 16                # small example: batch=2, spatial=16

    key = jax.random.PRNGKey(0)
    kx, kw, kg, kb = jax.random.split(key, 4)

    x = jax.random.normal(kx, (N, A, H, W), dtype=jnp.float32)
    # Conv2d weight (C, A, 1, 1), Kaiming-uniform-ish deterministic init.
    bound = 1.0 / (A * K * K) ** 0.5
    conv_w = jax.random.uniform(kw, (C, A, K, K), jnp.float32, -bound, bound)
    # BatchNorm affine params (deterministic, non-trivial).
    bn_gamma = 1.0 + 0.1 * jax.random.normal(kg, (C,), jnp.float32)
    bn_beta = 0.1 * jax.random.normal(kb, (C,), jnp.float32)

    out = primary_caps_forward(x, conv_w, bn_gamma, bn_beta, pad=pad)
    out = jax.block_until_ready(out)

    ref = _reference(x, conv_w, bn_gamma, bn_beta, pad=pad)
    assert out.shape == (N, C, H + 2 * pad, W + 2 * pad)
    err = float(jnp.max(jnp.abs(out - ref)))
    assert jnp.allclose(out, ref, atol=1e-3, rtol=1e-3), err

    print("KERNEL_OK")
</pallas_src>

<mosaic_0001>
module attributes {stable_mosaic.version = 11 : i64} {
  func.func @_pose_kernel(%arg0: i32, %arg1: memref<1x32x324xf32, #tpu.memory_space<vmem>>, %arg2: memref<512x32xf32, #tpu.memory_space<vmem>>, %arg3: memref<512x1xf32, #tpu.memory_space<vmem>>, %arg4: memref<512x1xf32, #tpu.memory_space<vmem>>, %arg5: memref<1x512x324xf32, #tpu.memory_space<vmem>>) attributes {dimension_semantics = [#tpu.dimension_semantics<parallel>], iteration_bounds = array<i64: 2>, scalar_prefetch = 0 : i64, scratch_operands = 0 : i64, tpu.core_type = #tpu.core_type<tc>, window_params = [{transform_indices = @transform_0, window_bounds = array<i64: 1, 32, 324>}, {pipeline_mode = #tpu.pipeline_mode<synchronous>, transform_indices = @transform_1, window_bounds = array<i64: 512, 32>}, {pipeline_mode = #tpu.pipeline_mode<synchronous>, transform_indices = @transform_2, window_bounds = array<i64: 512, 1>}, {pipeline_mode = #tpu.pipeline_mode<synchronous>, transform_indices = @transform_3, window_bounds = array<i64: 512, 1>}, {transform_indices = @transform_4, window_bounds = array<i64: 1, 512, 324>}]} {
    %c0 = arith.constant 0 : index
    %c0_0 = arith.constant 0 : index
    %0 = vector.load %arg2[%c0, %c0_0] : memref<512x32xf32, #tpu.memory_space<vmem>>, vector<512x32xf32>
    %c0_1 = arith.constant 0 : index
    %c0_2 = arith.constant 0 : index
    %c0_3 = arith.constant 0 : index
    %1 = vector.load %arg1[%c0_1, %c0_2, %c0_3] : memref<1x32x324xf32, #tpu.memory_space<vmem>>, vector<1x32x324xf32>
    %2 = vector.shape_cast %1 : vector<1x32x324xf32> to vector<32x324xf32>
    %cst = arith.constant dense<0.000000e+00> : vector<512x324xf32>
    %3 = tpu.matmul %0, %2, %cst {dimension_numbers = #tpu.dot_dimension_numbers<[1], [0], [0], [1], [0, 0, 1, 1], [], []>} : vector<512x32xf32>, vector<32x324xf32>, vector<512x324xf32> -> vector<512x324xf32>
    %c0_4 = arith.constant 0 : index
    %c0_5 = arith.constant 0 : index
    %4 = vector.load %arg3[%c0_4, %c0_5] : memref<512x1xf32, #tpu.memory_space<vmem>>, vector<512x1xf32>
    %5 = vector.broadcast %4 : vector<512x1xf32> to vector<512x324xf32>
    %6 = arith.mulf %3, %5 : vector<512x324xf32>
    %c0_6 = arith.constant 0 : index
    %c0_7 = arith.constant 0 : index
    %7 = vector.load %arg4[%c0_6, %c0_7] : memref<512x1xf32, #tpu.memory_space<vmem>>, vector<512x1xf32>
    %8 = vector.broadcast %7 : vector<512x1xf32> to vector<512x324xf32>
    %9 = arith.addf %6, %8 : vector<512x324xf32>
    %c0_8 = arith.constant 0 : index
    %c0_9 = arith.constant 0 : index
    %c0_10 = arith.constant 0 : index
    %10 = vector.load %arg5[%c0_8, %c0_9, %c0_10] : memref<1x512x324xf32, #tpu.memory_space<vmem>>, vector<1x512x324xf32>
    %11 = vector.shape_cast %10 : vector<1x512x324xf32> to vector<512x324xf32>
    %12 = vector.shape_cast %9 : vector<512x324xf32> to vector<1x512x324xf32>
    tpu.vector_store %arg5[%c0_8, %c0_9, %c0_10], %12 {strides = array<i32>} : memref<1x512x324xf32, #tpu.memory_space<vmem>>, vector<1x512x324xf32>,
    return
  }
  func.func @transform_0(%arg0: i32) -> (i32, i32, i32) {
    %c0_i32 = arith.constant 0 : i32
    %c0_i32_0 = arith.constant 0 : i32
    %c0_i32_1 = arith.constant 0 : i32
    return %arg0, %c0_i32, %c0_i32_0 : i32, i32, i32
  }
  func.func @transform_1(%arg0: i32) -> (i32, i32) {
    %c0_i32 = arith.constant 0 : i32
    %c0_i32_0 = arith.constant 0 : i32
    %c0_i32_1 = arith.constant 0 : i32
    return %c0_i32, %c0_i32_0 : i32, i32
  }
  func.func @transform_2(%arg0: i32) -> (i32, i32) {
    %c0_i32 = arith.constant 0 : i32
    %c0_i32_0 = arith.constant 0 : i32
    %c0_i32_1 = arith.constant 0 : i32
    return %c0_i32, %c0_i32_0 : i32, i32
  }
  func.func @transform_3(%arg0: i32) -> (i32, i32) {
    %c0_i32 = arith.constant 0 : i32
    %c0_i32_0 = arith.constant 0 : i32
    %c0_i32_1 = arith.constant 0 : i32
    return %c0_i32, %c0_i32_0 : i32, i32
  }
  func.func @transform_4(%arg0: i32) -> (i32, i32, i32) {
    %c0_i32 = arith.constant 0 : i32
    %c0_i32_0 = arith.constant 0 : i32
    %c0_i32_1 = arith.constant 0 : i32
    return %arg0, %c0_i32, %c0_i32_0 : i32, i32, i32
  }
}

</mosaic_0001>

<bundles_post_ra>
// kernel: tpu_custom_call.1
= control target key start
LH: loop header
LB: loop body
LE: loop exit
PB: predicated region body
PF: predicated region fallthrough
CT: control target
= control target key end

     0   :  { %9 = vsyncpa [#allocation3], 0  ;;  %s5304_s0 = inlined_call_operand.hbm [shape: f32[2,32,324], index: 0, kind: input, shape index: {}]   ;;  %s5305_s1 = inlined_call_operand.vmem [shape: f32[512,32], index: 1, kind: input, shape index: {}]   ;;  %s5306_s2 = inlined_call_operand.vmem [shape: f32[512,1], index: 2, kind: input, shape index: {}]   ;;  %s5307_s3 = inlined_call_operand.vmem [shape: f32[512,1], index: 3, kind: input, shape index: {}]   ;;  %s5308_s4 = inlined_call_operand.vmem [shape: f32[2,512,324], index: 4, kind: output, shape index: {}]  }
   0x1   :  { %11 = vsyncpa [#allocation3 + $0x1], 0  ;;  %s3206_s15 = smov 0   ;;  %s3208_s16 = smov 0  }
   0x2   :  { %s3210_s17 = smov 0   ;;  %s3212_s18 = smov 0  }
   0x3 LB: > { %s3225_s19 = sadd.s32 4294967295, %s3174_s18   ;;  %s3228_s20 = sadd.s32 1, %s3174_s18   ;;  %s3174_s18 = sphi %s3212_s18, %s5480_s18   ;;  %s3170_s17 = sphi %s3210_s17, %s5479_s17   ;;  %s3166_s16 = sphi %s3208_s16, %s5478_s16   ;;  %s3162_s15 = sphi %s3206_s15, %s5477_s15  }
   0x4   : > { %s21_s21 = ssub.s32 %s3174_s18, %s3228_s20  ;;  %s24_s22 = sadd.s32 1, %s3170_s17 }
   0x5   : > { %p22_p0 = scmp.eq.s32.totalorder %s21_s21, 0  ;;  %p31_p1 = scmp.ne.s32.totalorder %s3170_s17, %s3166_s16 }
   0x6   : > { %p32_p2 = scmp.eq.s32.totalorder %s3174_s18, 0  ;;  %p37_p3 = scmp.ne.s32.totalorder %s3166_s16, %s3162_s15 }
   0x7   : > { %s3238_s23 = scalar_select %p22_p0, %s3170_s17, %s24_s22  }
   0x8   : > { %p33_p4 = por %p32_p2, %p31_p1  ;;  %p38_p5 = scmp.eq.s32.totalorder %s3225_s19, 0 }
   0x9   : > { %p3071_p6 = scmp.lt.s32.totalorder %s3174_s18, 2  ;;  %s159_s25 = sand.u32 1, %s3170_s17  }
   0xa   : > { %p3242_p7 = por %p38_p5, %p37_p3  ;;  %s3061_s26 = smul.u32 96, %s159_s25 }
   0xb   : > { %s3062_s27 = smul.u32 1536, %s3174_s18  ;;  %p3248_p8 = pnand %p3071_p6, %p33_p4 }
   0xc   : > { %s163_s6 = scalar_lea.vmem [#allocation2], %s3061_s26  ;;  %s3260_s8 = scalar_lea.sflag [#allocation3], %s159_s25 }
   0xd   : > { %s3255_s5 = scalar_lea.hbm %s5304_s0, %s3062_s27  ;;  %s170_s7 = sshll.u32 %s163_s6, 4  ;;  %s3257_s7 = int_to_ptr.vmem [resolvable:$true] %s170_s7 }
   0xe   : > { %s3110_s9 = scalar_lea.hbm %s3255_s5, 1536  ;;  %p3112_p11 = pneg %p3248_p8 }
   0xf   : > { %p3111_p10 = scmp.ne.s32.totalorder %s3255_s5, %s3110_s9  ;;  %s3115_s12 = scalar_lea.hbm %s5304_s0, 3072 }
  0x10   : > { %p3116_p0 = scmp.lt.u32.totalorder %s3255_s5, %s5304_s0  ;;  %p3117_p1 = scmp.lt.u32.totalorder %s3115_s12, %s3110_s9 }
  0x11   : > { %p3113_p12 = pnand %p3112_p11, %p3111_p10  ;;  %p3119_p3 = scmp.lt.u32.totalorder %s3110_s9, %s3255_s5 }
  0x12   : > { %p3118_p2 = por %p3117_p1, %p3116_p0 }
  0x13   : > { %p3114_p13 = pneg %p3113_p12 }
  0x14   : > { %p3120_p4 = por %p3119_p3, %p3118_p2 }
  0x16   : > { %p3121_p5 = pnand %p3120_p4, %p3114_p13 }
  0x18   : > { %3124 = shalt.err (!%p3121_p5)
}
  0x19   : > { %s3125_s15 = scalar_lea.vmem %s3257_s7, 1536  ;;  %s3176_s21 = smov [#allocation2]  }
  0x1a   : > { %p3126_p6 = scmp.ne.s32.totalorder %s3257_s7, %s3125_s15  ;;  %s3130_s22 = sshll.u32 %s3176_s21, 4  ;;  %s3131_s22 = int_to_ptr.vmem [resolvable:$false] %s3130_s22 }
  0x1b   : > { %s3132_s25 = scalar_lea.vmem %s3131_s22, 3072  ;;  %p3133_p9 = scmp.lt.s32.totalorder %s3257_s7, %s3131_s22 }
  0x1c   : > { %p3128_p10 = pnand %p3126_p6, %p3112_p11  ;;  %p3134_p0 = scmp.lt.s32.totalorder %s3132_s25, %s3125_s15 }
  0x1e   : > { %p3129_p12 = pneg %p3128_p10  ;;  %p3135_p1 = por %p3134_p0, %p3133_p9 }
  0x20   : > { %p3136_p2 = pnand %p3135_p1, %p3129_p12 }
  0x22   : > { %3139 = shalt.err (!%p3136_p2)
}
  0x23   : > { %s3177_s26 = smov 384   ;;  %s3178_s27 = smov 24  }
  0x24   : > { %3070 = dma.hbm_to_vmem [thread:$0]  (!%p3248_p8), %s3255_s5, 1536, %s3257_s7, %s3260_s8, %s3177_s26, %s3177_s26, %s3178_s27  }
  0x25   : > { %p178_p11 = scmp.lt.s32.totalorder %s3174_s18, 3  ;;  %p5346_p13 = scmp.ge.s32.totalorder %s3174_s18, 1 }
  0x27   : > { %p179_p3 = pnand %p5346_p13, %p178_p11 }
  0x29   : > { %182 = sbr.rel (%p179_p3) target bundleno = 471 (0x1d7), region = 36 }
  0x30   : > { %s184_s29 = sand.u32 1, %s3166_s16  }
  0x31   : > { %s3063_s30 = smul.u32 96, %s184_s29  ;;  %s185_s6 = scalar_lea.sflag [#allocation3], %s184_s29 }
  0x33   : > { %s3292_s9 = scalar_lea.vmem [#allocation2], %s3063_s30 }
  0x34   : > { %3157 = dma.done.wait (%p3242_p7), %s185_s6, 1536  }
  0x35   : > { %3159 = vsyncadd (%p3242_p7), %s185_s6, 4294965760  ;;  %v3179_v0 = vmov 0   ;;  %v3180_v1 = vmov 0.0   ;;  %v1323_v2 = vld [vmem:[%s5306_s2 + $0x10] sm:$0xff]  ;;  %v1321_v3 = vld [vmem:[%s5306_s2] sm:$0xff]  ;;  %vm294_vm0 = vcmask 261120  }
  0x36   : > { %3109 = vset.pattern.permute.xlu1 %v3179_v0  ;;  %3108 = vset.pattern.permute.xlu0 %v3179_v0  ;;  %v283_v4 = vld [vmem:[%s3292_s9 + $0x8] sm:$0xff]  ;;  %v286_v5 = vld [vmem:[%s3292_s9 + $0x20] sm:$0xff]  ;;  %v285_v7 = vld [vmem:[%s3292_s9 + $0x18] sm:$0xff]  ;;  %p213_p7 = scmp.lt.s32.totalorder %s3225_s19, 1  ;;  %vm2475_vm1 = vcmask 556032  }
  0x37   : > { %551 = vmatprep.mubr.f32.mxu0 %v3180_v1  ;;  %839 = vmatprep.mubr.f32.mxu1 %v3180_v1  ;;  %v282_v6 = vld [vmem:[%s3292_s9] sm:$0xff]  ;;  %v3041_v8 = vpack.c.bf16 %v286_v5, %v283_v4  ;;  %v1324_v10 = vld [vmem:[%s5306_s2 + $0x18] sm:$0xff]  ;;  %v1322_v11 = vld [vmem:[%s5306_s2 + $0x8] sm:$0xff] }
  0x38   : > { %1397 = vperm.xlu1 %3109, %v1323_v2   ;;  %1387 = vperm.xlu0 %3108, %v1321_v3   ;;  %v3043_v9 = vpack.c.bf16 %v285_v7, %v282_v6  ;;  %v289_v12 = vld [vmem:[%s3292_s9 + $0x38] sm:$0xff]  ;;  %v292_v13 = vld [vmem:[%s3292_s9 + $0x50] sm:$0xff]  ;;  %v291_v15 = vld [vmem:[%s3292_s9 + $0x48] sm:$0xff]  ;;  %s5482_s19 = smov (!%p213_p7, %s3225_s19), 1 }
  0x39   : > { %v288_v14 = vld [vmem:[%s3292_s9 + $0x30] sm:$0xff]  ;;  %3042 = vmatprep.subr.bf16.mxu0 %v3041_v8  ;;  %3057 = vmatprep.subr.bf16.mxu1 %v3041_v8  ;;  %v3045_v16 = vpack.c.bf16 %v292_v13, %v289_v12  ;;  %v287_v19 = vld [vmem:[%s3292_s9 + $0x28] sm:$0xff]  ;;  %v1325_v21 = vld [vmem:[%s5306_s2 + $0x20] sm:$0xff]  ;;  %s3064_s11 = smul.u32 1536, %s5482_s19 }
  0x3a   : > { %3044 = vmatpush1.bf16.msra.mxu0 %v3043_v9  ;;  %3059 = vmatpush1.bf16.msra.mxu1 %v3043_v9  ;;  %v3047_v17 = vpack.c.bf16 %v291_v15, %v288_v14  ;;  %v284_v18 = vld [vmem:[%s3292_s9 + $0x10] sm:$0xff]  ;;  %v1326_v20 = vld [vmem:[%s5306_s2 + $0x28] sm:$0xff]  ;;  %v3331_v23 = vld [vmem:[%s5305_s1] sm:$0xff] }
  0x3b   : > { %3046 = vmatprep.subr.bf16.mxu0 %v3045_v16  ;;  %3058 = vmatprep.subr.bf16.mxu1 %v3045_v16  ;;  %v3049_v22 = vpack.c.bf16 %v287_v19, %v284_v18  ;;  %v3336_v24 = vld [vmem:[%s5305_s1 + $0x180] sm:$0xff]  ;;  %v1328_v25 = vld [vmem:[%s5306_s2 + $0x38] sm:$0xff]  ;;  %v1327_v26 = vld [vmem:[%s5306_s2 + $0x30] sm:$0xff]  ;;  %s4451_s13 = scalar_lea.vmem %s5308_s4, %s3064_s11 }
  0x3c   : > { %1402 = vperm.xlu1 %3109, %v1324_v10   ;;  %1392 = vperm.xlu0 %3108, %v1322_v11   ;;  %v3352_v27 = vld [vmem:[%s5305_s1 + $0x8] sm:$0xff]  ;;  %v1329_v30 = vld [vmem:[%s5306_s2 + $0x40] sm:$0xff]  ;;  %v3376_v32 = vld [vmem:[%s5305_s1 + $0x10] sm:$0xff] }
  0x3d   : > { %v3357_v28 = vld [vmem:[%s5305_s1 + $0x188] sm:$0xff]  ;;  %v290_v31 = vld [vmem:[%s3292_s9 + $0x40] sm:$0xff]  ;;  %v3381_v33 = vld [vmem:[%s5305_s1 + $0x190] sm:$0xff] }
  0x3e   : > { %3048 = vmatpush1.bf16.msra.mxu0 %v3047_v17  ;;  %3060 = vmatpush1.bf16.msra.mxu1 %v3047_v17  ;;  %v1330_v29 = vld [vmem:[%s5306_s2 + $0x48] sm:$0xff]  ;;  %v293_v34 = vld [vmem:[%s3292_s9 + $0x58] sm:$0xff]  ;;  %v1331_v36 = vld [vmem:[%s5306_s2 + $0x50] sm:$0xff] }
  0x3f   : > { %3050 = vmatprep.subr.bf16.mxu1 %v3049_v22  ;;  %v1332_v35 = vld [vmem:[%s5306_s2 + $0x58] sm:$0xff]  ;;  %v3053_v37 = vpack.c.bf16 %v293_v34, %v290_v31  ;;  %v1334_v40 = vld [vmem:[%s5306_s2 + $0x68] sm:$0xff]  ;;  %v1333_v41 = vld [vmem:[%s5306_s2 + $0x60] sm:$0xff] }
  0x40   : > { %1412 = vperm.xlu1 %3109, %v1326_v20   ;;  %1407 = vperm.xlu0 %3108, %v1325_v21   ;;  %v3399_v38 = vld [vmem:[%s5305_s1 + $0x18] sm:$0xff]  ;;  %v3421_v42 = vld [vmem:[%s5305_s1 + $0x20] sm:$0xff]  ;;  %v1335_v45 = vld [vmem:[%s5306_s2 + $0x70] sm:$0xff] }
  0x41   : > { %2739 = vmatmul.mubr.msk.f32.vlgmr.msra.gmra.mrb[0].mxu0 %vm294_vm0, %v3331_v23  ;;  %2787 = vmatmul.mubr.msk.f32.vlgmr.msra.gmra.mrb[0].mxu1 %vm294_vm0, %v3336_v24  ;;  %v3404_v39 = vld [vmem:[%s5305_s1 + $0x198] sm:$0xff]  ;;  %v3426_v43 = vld [vmem:[%s5305_s1 + $0x1a0] sm:$0xff]  ;;  %v3443_v46 = vld [vmem:[%s5305_s1 + $0x28] sm:$0xff] }
  0x42   : > { %3052 = vmatpush3.bf16.msra.mxu1 %v3049_v22  ;;  %557 = vmatprep.mubr.f32.mxu0 %v3180_v1  ;;  %v1336_v44 = vld [vmem:[%s5306_s2 + $0x78] sm:$0xff]  ;;  %v3448_v47 = vld [vmem:[%s5305_s1 + $0x1a8] sm:$0xff]  ;;  %v1337_v49 = vld [vmem:[%s5306_s2 + $0x80] sm:$0xff] }
  0x43   : > { %845 = vmatprep.mubr.f32.mxu1 %v3180_v1  ;;  %3054 = vmatprep.subr.bf16.mxu1 %v3053_v37  ;;  %v1338_v48 = vld [vmem:[%s5306_s2 + $0x88] sm:$0xff]  ;;  %v3465_v50 = vld [vmem:[%s5305_s1 + $0x30] sm:$0xff]  ;;  %v1340_v52 = vld [vmem:[%s5306_s2 + $0x98] sm:$0xff] }
  0x44   : > { %1422 = vperm.xlu1 %3109, %v1328_v25   ;;  %1417 = vperm.xlu0 %3108, %v1327_v26   ;;  %v3470_v51 = vld [vmem:[%s5305_s1 + $0x1b0] sm:$0xff]  ;;  %v3487_v54 = vld [vmem:[%s5305_s1 + $0x38] sm:$0xff]  ;;  %v1342_v56 = vld [vmem:[%s5306_s2 + $0xa8] sm:$0xff] }
  0x45   : > { %2740 = vmatmul.mubr.msk.f32.gmra.mrb[2].mxu0 %vm294_vm0, %v3352_v27  ;;  %2788 = vmatmul.mubr.msk.f32.gmra.mrb[2].mxu1 %vm294_vm0, %v3357_v28  ;;  %v1339_v53 = vld [vmem:[%s5306_s2 + $0x90] sm:$0xff]  ;;  %v3492_v55 = vld [vmem:[%s5305_s1 + $0x1b8] sm:$0xff]  ;;  %v1341_v57 = vld [vmem:[%s5306_s2 + $0xa0] sm:$0xff] }
  0x46   : > { %563 = vmatprep.mubr.f32.mxu0 %v3180_v1  ;;  %851 = vmatprep.mubr.f32.mxu1 %v3180_v1  ;;  %v3509_v58 = vld [vmem:[%s5305_s1 + $0x40] sm:$0xff]  ;;  %v1344_v60 = vld [vmem:[%s5306_s2 + $0xb8] sm:$0xff]  ;;  %v1343_v61 = vld [vmem:[%s5306_s2 + $0xb0] sm:$0xff] }
  0x47   : > { %3056 = vmatpush3.bf16.msra.mxu1 %v3053_v37  ;;  %v3514_v59 = vld [vmem:[%s5305_s1 + $0x1c0] sm:$0xff]  ;;  %v3531_v62 = vld [vmem:[%s5305_s1 + $0x48] sm:$0xff]  ;;  %v3553_v3 = vld [vmem:[%s5305_s1 + $0x50] sm:$0xff] }
  0x48   : > { %1432 = vperm.xlu1 %3109, %v1330_v29   ;;  %1427 = vperm.xlu0 %3108, %v1329_v30   ;;  %v3536_v63 = vld [vmem:[%s5305_s1 + $0x1c8] sm:$0xff]  ;;  %v1345_v2 = vld [vmem:[%s5306_s2 + $0xc0] sm:$0xff]  ;;  %v3558_v4 = vld [vmem:[%s5305_s1 + $0x1d0] sm:$0xff] }
  0x49   : > { %2741 = vmatmul.mubr.msk.f32.gmra.mrb[4].mxu0 %vm294_vm0, %v3376_v32  ;;  %2789 = vmatmul.mubr.msk.f32.gmra.mrb[4].mxu1 %vm294_vm0, %v3381_v33  ;;  %v1346_v0 = vld [vmem:[%s5306_s2 + $0xc8] sm:$0xff]  ;;  %v1348_v5 = vld [vmem:[%s5306_s2 + $0xd8] sm:$0xff]  ;;  %v1347_v6 = vld [vmem:[%s5306_s2 + $0xd0] sm:$0xff] }
  0x4a   : > { %569 = vmatprep.mubr.f32.mxu0 %v3180_v1  ;;  %857 = vmatprep.mubr.f32.mxu1 %v3180_v1  ;;  %v3575_v7 = vld [vmem:[%s5305_s1 + $0x58] sm:$0xff]  ;;  %v1350_v9 = vld [vmem:[%s5306_s2 + $0xe8] sm:$0xff]  ;;  %v1349_v10 = vld [vmem:[%s5306_s2 + $0xe0] sm:$0xff] }
  0x4b   : > { %v3580_v8 = vld [vmem:[%s5305_s1 + $0x1d8] sm:$0xff]  ;;  %v3597_v11 = vld [vmem:[%s5305_s1 + $0x60] sm:$0xff]  ;;  %v1351_v14 = vld [vmem:[%s5306_s2 + $0xf0] sm:$0xff] }
  0x4c   : > { %1442 = vperm.xlu1 %3109, %v1332_v35   ;;  %1437 = vperm.xlu0 %3108, %v1331_v36   ;;  %v3602_v12 = vld [vmem:[%s5305_s1 + $0x1e0] sm:$0xff]  ;;  %v1352_v13 = vld [vmem:[%s5306_s2 + $0xf8] sm:$0xff]  ;;  %v3619_v15 = vld [vmem:[%s5305_s1 + $0x68] sm:$0xff] }
  0x4d   : > { %2742 = vmatmul.mubr.msk.f32.gmra.mrb[6].mxu0 %vm294_vm0, %v3399_v38  ;;  %2790 = vmatmul.mubr.msk.f32.gmra.mrb[6].mxu1 %vm294_vm0, %v3404_v39  ;;  %v3624_v16 = vld [vmem:[%s5305_s1 + $0x1e8] sm:$0xff]  ;;  %v1353_v18 = vld [vmem:[%s5306_s2 + $0x100] sm:$0xff]  ;;  %v3641_v19 = vld [vmem:[%s5305_s1 + $0x70] sm:$0xff] }
  0x4e   : > { %575 = vmatprep.mubr.f32.mxu0 %v3180_v1  ;;  %863 = vmatprep.mubr.f32.mxu1 %v3180_v1  ;;  %v1354_v17 = vld [vmem:[%s5306_s2 + $0x108] sm:$0xff]  ;;  %v3646_v20 = vld [vmem:[%s5305_s1 + $0x1f0] sm:$0xff]  ;;  %v1356_v21 = vld [vmem:[%s5306_s2 + $0x118] sm:$0xff] }
  0x4f   : > { %v1355_v22 = vld [vmem:[%s5306_s2 + $0x110] sm:$0xff]  ;;  %v3663_v25 = vld [vmem:[%s5305_s1 + $0x78] sm:$0xff]  ;;  %v1358_v29 = vld [vmem:[%s5306_s2 + $0x128] sm:$0xff] }
  0x50   : > { %1452 = vperm.xlu1 %3109, %v1334_v40   ;;  %1447 = vperm.xlu0 %3108, %v1333_v41   ;;  %v3668_v26 = vld [vmem:[%s5305_s1 + $0x1f8] sm:$0xff]  ;;  %v1357_v30 = vld [vmem:[%s5306_s2 + $0x120] sm:$0xff]  ;;  %v1359_v35 = vld [vmem:[%s5306_s2 + $0x130] sm:$0xff] }
  0x51   : > { %2743 = vmatmul.mubr.msk.f32.gmra.mrb[8].mxu0 %vm294_vm0, %v3421_v42  ;;  %2791 = vmatmul.mubr.msk.f32.gmra.mrb[8].mxu1 %vm294_vm0, %v3426_v43  ;;  %v3686_v31 = vld [vmem:[%s5305_s1 + $0x80] sm:$0xff]  ;;  %v1360_v34 = vld [vmem:[%s5306_s2 + $0x138] sm:$0xff]  ;;  %v1362_v36 = vld [vmem:[%s5306_s2 + $0x148] sm:$0xff] }
  0x52   : > { %581 = vmatprep.mubr.f32.mxu0 %v3180_v1  ;;  %869 = vmatprep.mubr.f32.mxu1 %v3180_v1  ;;  %v1364_v37 = vld [vmem:[%s5306_s2 + $0x158] sm:$0xff]  ;;  %v1363_v40 = vld [vmem:[%s5306_s2 + $0x150] sm:$0xff]  ;;  %v1366_v41 = vld [vmem:[%s5306_s2 + $0x168] sm:$0xff] }
  0x54   : > { %1462 = vperm.xlu1 %3109, %v1336_v44   ;;  %1457 = vperm.xlu0 %3108, %v1335_v45   ;;  %v238_v44 = vld [vmem:[%s5305_s1 + $0xa0] sm:$0xff]  ;;  %v1368_v45 = vld [vmem:[%s5306_s2 + $0x178] sm:$0xff] }
  0x55   : > { %2744 = vmatmul.mubr.msk.f32.gmra.mrb[10].mxu0 %vm294_vm0, %v3443_v46  ;;  %2792 = vmatmul.mubr.msk.f32.gmra.mrb[10].mxu1 %vm294_vm0, %v3448_v47 }
  0x56   : > { %587 = vmatprep.mubr.f32.mxu0 %v3180_v1  ;;  %875 = vmatprep.mubr.f32.mxu1 %v3180_v1 }
  0x58   : > { %1472 = vperm.xlu1 %3109, %v1338_v48   ;;  %1467 = vperm.xlu0 %3108, %v1337_v49   ;;  %v239_v48 = vld [vmem:[%s5305_s1 + $0xa8] sm:$0xff] }
  0x59   : > { %2745 = vmatmul.mubr.msk.f32.gmra.mrb[12].mxu0 %vm294_vm0, %v3465_v50  ;;  %2793 = vmatmul.mubr.msk.f32.gmra.mrb[12].mxu1 %vm294_vm0, %v3470_v51  ;;  %v1370_v49 = vld [vmem:[%s5306_s2 + $0x188] sm:$0xff] }
  0x5a   : > { %593 = vmatprep.mubr.f32.mxu0 %v3180_v1  ;;  %881 = vmatprep.mubr.f32.mxu1 %v3180_v1 }
  0x5c   : > { %1482 = vperm.xlu1 %3109, %v1340_v52   ;;  %1477 = vperm.xlu0 %3108, %v1339_v53   ;;  %v240_v52 = vld [vmem:[%s5305_s1 + $0xb0] sm:$0xff]  ;;  %v1372_v53 = vld [vmem:[%s5306_s2 + $0x198] sm:$0xff] }
  0x5d   : > { %2746 = vmatmul.mubr.msk.f32.gmra.mrb[14].mxu0 %vm294_vm0, %v3487_v54  ;;  %2794 = vmatmul.mubr.msk.f32.gmra.mrb[14].mxu1 %vm294_vm0, %v3492_v55 }
  0x5e   : > { %599 = vmatprep.mubr.f32.mxu0 %v3180_v1  ;;  %887 = vmatprep.mubr.f32.mxu1 %v3180_v1 }
  0x60   : > { %1492 = vperm.xlu1 %3109, %v1342_v56   ;;  %1487 = vperm.xlu0 %3108, %v1341_v57   ;;  %v241_v56 = vld [vmem:[%s5305_s1 + $0xb8] sm:$0xff]  ;;  %v1374_v57 = vld [vmem:[%s5306_s2 + $0x1a8] sm:$0xff] }
  0x61   : > { %2747 = vmatmul.mubr.msk.f32.gmra.mrb[16].mxu0 %vm294_vm0, %v3509_v58  ;;  %2795 = vmatmul.mubr.msk.f32.gmra.mrb[16].mxu1 %vm294_vm0, %v3514_v59 }
  0x62   : > { %605 = vmatprep.mubr.f32.mxu0 %v3180_v1  ;;  %893 = vmatprep.mubr.f32.mxu1 %v3180_v1 }
  0x64   : > { %1502 = vperm.xlu1 %3109, %v1344_v60   ;;  %1497 = vperm.xlu0 %3108, %v1343_v61   ;;  %v242_v60 = vld [vmem:[%s5305_s1 + $0xc0] sm:$0xff]  ;;  %v1376_v61 = vld [vmem:[%s5306_s2 + $0x1b8] sm:$0xff] }
  0x65   : > { %2748 = vmatmul.mubr.msk.f32.gmra.mrb[18].mxu0 %vm294_vm0, %v3531_v62  ;;  %2796 = vmatmul.mubr.msk.f32.gmra.mrb[18].mxu1 %vm294_vm0, %v3536_v63 }
  0x66   : > { %611 = vmatprep.mubr.f32.mxu0 %v3180_v1  ;;  %899 = vmatprep.mubr.f32.mxu1 %v3180_v1 }
  0x68   : > { %1512 = vperm.xlu1 %3109, %v1346_v0   ;;  %1507 = vperm.xlu0 %3108, %v1345_v2   ;;  %v243_v0 = vld [vmem:[%s5305_s1 + $0xc8] sm:$0xff] }
  0x69   : > { %2749 = vmatmul.mubr.msk.f32.gmra.mrb[20].mxu0 %vm294_vm0, %v3553_v3  ;;  %2797 = vmatmul.mubr.msk.f32.gmra.mrb[20].mxu1 %vm294_vm0, %v3558_v4  ;;  %v1378_v2 = vld [vmem:[%s5306_s2 + $0x1c8] sm:$0xff] }
  0x6a   : > { %617 = vmatprep.mubr.f32.mxu0 %v3180_v1  ;;  %905 = vmatprep.mubr.f32.mxu1 %v3180_v1 }
  0x6c   : > { %1522 = vperm.xlu1 %3109, %v1348_v5   ;;  %1517 = vperm.xlu0 %3108, %v1347_v6   ;;  %v244_v5 = vld [vmem:[%s5305_s1 + $0xd0] sm:$0xff]  ;;  %v1380_v6 = vld [vmem:[%s5306_s2 + $0x1d8] sm:$0xff] }
  0x6d   : > { %2750 = vmatmul.mubr.msk.f32.gmra.mrb[22].mxu0 %vm294_vm0, %v3575_v7  ;;  %2798 = vmatmul.mubr.msk.f32.gmra.mrb[22].mxu1 %vm294_vm0, %v3580_v8 }
  0x6e   : > { %623 = vmatprep.mubr.f32.mxu0 %v3180_v1  ;;  %911 = vmatprep.mubr.f32.mxu1 %v3180_v1 }
  0x70   : > { %1532 = vperm.xlu1 %3109, %v1350_v9   ;;  %1527 = vperm.xlu0 %3108, %v1349_v10   ;;  %v245_v9 = vld [vmem:[%s5305_s1 + $0xd8] sm:$0xff]  ;;  %v1382_v10 = vld [vmem:[%s5306_s2 + $0x1e8] sm:$0xff] }
  0x71   : > { %2751 = vmatmul.mubr.msk.f32.gmra.mrb[24].mxu0 %vm294_vm0, %v3597_v11  ;;  %2799 = vmatmul.mubr.msk.f32.gmra.mrb[24].mxu1 %vm294_vm0, %v3602_v12 }
  0x72   : > { %629 = vmatprep.mubr.f32.mxu0 %v3180_v1  ;;  %917 = vmatprep.mubr.f32.mxu1 %v3180_v1 }
  0x74   : > { %1542 = vperm.xlu1 %3109, %v1352_v13   ;;  %1537 = vperm.xlu0 %3108, %v1351_v14   ;;  %v246_v13 = vld [vmem:[%s5305_s1 + $0xe0] sm:$0xff]  ;;  %v1384_v14 = vld [vmem:[%s5306_s2 + $0x1f8] sm:$0xff] }
  0x75   : > { %2752 = vmatmul.mubr.msk.f32.gmra.mrb[26].mxu0 %vm294_vm0, %v3619_v15  ;;  %2800 = vmatmul.mubr.msk.f32.gmra.mrb[26].mxu1 %vm294_vm0, %v3624_v16 }
  0x76   : > { %635 = vmatprep.mubr.f32.mxu0 %v3180_v1  ;;  %923 = vmatprep.mubr.f32.mxu1 %v3180_v1 }
  0x78   : > { %1552 = vperm.xlu1 %3109, %v1354_v17   ;;  %1547 = vperm.xlu0 %3108, %v1353_v18   ;;  %v247_v17 = vld [vmem:[%s5305_s1 + $0xe8] sm:$0xff] }
  0x79   : > { %2753 = vmatmul.mubr.msk.f32.gmra.mrb[28].mxu0 %vm294_vm0, %v3641_v19  ;;  %2801 = vmatmul.mubr.msk.f32.gmra.mrb[28].mxu1 %vm294_vm0, %v3646_v20  ;;  %v1898_v18 = vld [vmem:[%s5307_s3 + $0x8] sm:$0xff] }
  0x7a   : > { %641 = vmatprep.mubr.f32.mxu0 %v3180_v1  ;;  %929 = vmatprep.mubr.f32.mxu1 %v3180_v1 }
  0x7c   : > { %1562 = vperm.xlu1 %3109, %v1356_v21   ;;  %1557 = vperm.xlu0 %3108, %v1355_v22  }
  0x7d   : > { %2754 = vmatmul.mubr.msk.f32.gmra.mrb[30].mxu0 %vm294_vm0, %v3663_v25  ;;  %2802 = vmatmul.mubr.msk.f32.gmra.mrb[30].mxu1 %vm294_vm0, %v3668_v26 }
  0x7e   : > { %647 = vmatprep.mubr.f32.mxu0 %v3180_v1  ;;  %2945 = vmatprep.mubr.msk.f32.mxu1 %vm294_vm0, %v3331_v23  ;;  %v3704_v23 = vld [vmem:[%s5305_s1 + $0x88] sm:$0xff] }
  0x80   : > { %1572 = vperm.xlu1 %3109, %v1358_v29   ;;  %1567 = vperm.xlu0 %3108, %v1357_v30   ;;  %v1900_v29 = vld [vmem:[%s5307_s3 + $0x18] sm:$0xff]  ;;  %v1899_v30 = vld [vmem:[%s5307_s3 + $0x10] sm:$0xff] }
  0x81   : > { %2755 = vmatmul.mubr.msk.f32.gmra.mrb[32].mxu0 %vm294_vm0, %v3686_v31  ;;  %2946 = vmatmul.mubr.msk.f32.vlgmr.msra.gmra.mrb[32].mxu1 %vm294_vm0, %v3352_v27  ;;  %v1361_v27 = vld [vmem:[%s5306_s2 + $0x140] sm:$0xff] }
  0x82   : > { %653 = vmatprep.mubr.f32.mxu0 %v3180_v1  ;;  %2948 = vmatprep.mubr.msk.f32.mxu1 %vm294_vm0, %v3376_v32  ;;  %v236_v32 = vld [vmem:[%s5305_s1 + $0x90] sm:$0xff] }
  0x84   : > { %1582 = vperm.xlu1 %3109, %v1360_v34   ;;  %1577 = vperm.xlu0 %3108, %v1359_v35   ;;  %v249_v35 = vld [vmem:[%s5305_s1 + $0xf8] sm:$0xff] }
  0x85   : > { %2756 = vmatmul.mubr.msk.f32.gmra.mrb[34].mxu0 %vm294_vm0, %v3704_v23  ;;  %2949 = vmatmul.mubr.msk.f32.gmra.mrb[34].mxu1 %vm294_vm0, %v3399_v38  ;;  %v237_v38 = vld [vmem:[%s5305_s1 + $0x98] sm:$0xff] }
  0x86   : > { %659 = vmatprep.mubr.f32.mxu0 %v3180_v1  ;;  %2951 = vmatprep.mubr.msk.f32.mxu1 %vm294_vm0, %v3421_v42  ;;  %v1365_v42 = vld [vmem:[%s5306_s2 + $0x160] sm:$0xff] }
  0x88   : > { %1592 = vperm.xlu1 %3109, %v1362_v36   ;;  %1587 = vperm.xlu0 %3108, %v1361_v27   ;;  %v1902_v36 = vld [vmem:[%s5307_s3 + $0x28] sm:$0xff]  ;;  %v1901_v27 = vld [vmem:[%s5307_s3 + $0x20] sm:$0xff] }
  0x89   : > { %2757 = vmatmul.mubr.msk.f32.gmra.mrb[36].mxu0 %vm294_vm0, %v236_v32  ;;  %2952 = vmatmul.mubr.msk.f32.gmra.mrb[36].mxu1 %vm294_vm0, %v3443_v46  ;;  %v1367_v46 = vld [vmem:[%s5306_s2 + $0x170] sm:$0xff] }
  0x8a   : > { %665 = vmatprep.mubr.f32.mxu0 %v3180_v1  ;;  %2954 = vmatprep.mubr.msk.f32.mxu1 %vm294_vm0, %v3465_v50  ;;  %v1369_v50 = vld [vmem:[%s5306_s2 + $0x180] sm:$0xff] }
  0x8c   : > { %1602 = vperm.xlu1 %3109, %v1364_v37   ;;  %1597 = vperm.xlu0 %3108, %v1363_v40   ;;  %v251_v40 = vld [vmem:[%s5305_s1 + $0x108] sm:$0xff] }
  0x8d   : > { %2758 = vmatmul.mubr.msk.f32.gmra.mrb[38].mxu0 %vm294_vm0, %v237_v38  ;;  %2955 = vmatmul.mubr.msk.f32.gmra.mrb[38].mxu1 %vm294_vm0, %v3487_v54  ;;  %v1371_v54 = vld [vmem:[%s5306_s2 + $0x190] sm:$0xff] }
  0x8e   : > { %671 = vmatprep.mubr.f32.mxu0 %v3180_v1  ;;  %2957 = vmatprep.mubr.msk.f32.mxu1 %vm294_vm0, %v3509_v58  ;;  %v1373_v58 = vld [vmem:[%s5306_s2 + $0x1a0] sm:$0xff] }
  0x90   : > { %1612 = vperm.xlu1 %3109, %v1366_v41   ;;  %1607 = vperm.xlu0 %3108, %v1365_v42   ;;  %v1904_v41 = vld [vmem:[%s5307_s3 + $0x38] sm:$0xff]  ;;  %v1903_v42 = vld [vmem:[%s5307_s3 + $0x30] sm:$0xff] }
  0x91   : > { %2759 = vmatmul.mubr.msk.f32.gmra.mrb[40].mxu0 %vm294_vm0, %v238_v44  ;;  %2958 = vmatmul.mubr.msk.f32.gmra.mrb[40].mxu1 %vm294_vm0, %v3531_v62  ;;  %v1375_v62 = vld [vmem:[%s5306_s2 + $0x1b0] sm:$0xff] }
  0x92   : > { %677 = vmatprep.mubr.f32.mxu0 %v3180_v1  ;;  %2960 = vmatprep.mubr.msk.f32.mxu1 %vm294_vm0, %v3553_v3  ;;  %v1377_v3 = vld [vmem:[%s5306_s2 + $0x1c0] sm:$0xff] }
  0x94   : > { %1622 = vperm.xlu1 %3109, %v1368_v45   ;;  %1617 = vperm.xlu0 %3108, %v1367_v46   ;;  %v253_v46 = vld [vmem:[%s5305_s1 + $0x118] sm:$0xff] }
  0x95   : > { %2760 = vmatmul.mubr.msk.f32.gmra.mrb[42].mxu0 %vm294_vm0, %v239_v48  ;;  %2961 = vmatmul.mubr.msk.f32.gmra.mrb[42].mxu1 %vm294_vm0, %v3575_v7  ;;  %v1379_v7 = vld [vmem:[%s5306_s2 + $0x1d0] sm:$0xff] }
  0x96   : > { %683 = vmatprep.mubr.f32.mxu0 %v3180_v1  ;;  %2963 = vmatprep.mubr.msk.f32.mxu1 %vm294_vm0, %v3597_v11  ;;  %v1381_v11 = vld [vmem:[%s5306_s2 + $0x1e0] sm:$0xff] }
  0x98   : > { %1632 = vperm.xlu1 %3109, %v1370_v49   ;;  %1627 = vperm.xlu0 %3108, %v1369_v50   ;;  %v1906_v49 = vld [vmem:[%s5307_s3 + $0x48] sm:$0xff]  ;;  %v1905_v50 = vld [vmem:[%s5307_s3 + $0x40] sm:$0xff] }
  0x99   : > { %2761 = vmatmul.mubr.msk.f32.gmra.mrb[44].mxu0 %vm294_vm0, %v240_v52  ;;  %2964 = vmatmul.mubr.msk.f32.gmra.mrb[44].mxu1 %vm294_vm0, %v3619_v15  ;;  %v1383_v15 = vld [vmem:[%s5306_s2 + $0x1f0] sm:$0xff] }
  0x9a   : > { %689 = vmatprep.mubr.f32.mxu0 %v3180_v1  ;;  %2966 = vmatprep.mubr.msk.f32.mxu1 %vm294_vm0, %v3641_v19  ;;  %v1897_v19 = vld [vmem:[%s5307_s3] sm:$0xff] }
  0x9c   : > { %1642 = vperm.xlu1 %3109, %v1372_v53   ;;  %1637 = vperm.xlu0 %3108, %v1371_v54   ;;  %v255_v54 = vld [vmem:[%s5305_s1 + $0x128] sm:$0xff] }
  0x9d   : > { %2762 = vmatmul.mubr.msk.f32.gmra.mrb[46].mxu0 %vm294_vm0, %v241_v56  ;;  %2967 = vmatmul.mubr.msk.f32.gmra.mrb[46].mxu1 %vm294_vm0, %v3663_v25  ;;  %v248_v25 = vld [vmem:[%s5305_s1 + $0xf0] sm:$0xff] }
  0x9e   : > { %695 = vmatprep.mubr.f32.mxu0 %v3180_v1  ;;  %2969 = vmatprep.mubr.msk.f32.mxu1 %vm294_vm0, %v3686_v31 }
  0xa0   : > { %1652 = vperm.xlu1 %3109, %v1374_v57   ;;  %1647 = vperm.xlu0 %3108, %v1373_v58   ;;  %v1908_v57 = vld [vmem:[%s5307_s3 + $0x58] sm:$0xff]  ;;  %v1907_v58 = vld [vmem:[%s5307_s3 + $0x50] sm:$0xff] }
  0xa1   : > { %2763 = vmatmul.mubr.msk.f32.gmra.mrb[48].mxu0 %vm294_vm0, %v242_v60  ;;  %2970 = vmatmul.mubr.msk.f32.gmra.mrb[48].mxu1 %vm294_vm0, %v3704_v23  ;;  %v250_v23 = vld [vmem:[%s5305_s1 + $0x100] sm:$0xff] }
  0xa2   : > { %701 = vmatprep.mubr.f32.mxu0 %v3180_v1  ;;  %2972 = vmatprep.mubr.msk.f32.mxu1 %vm294_vm0, %v236_v32 }
  0xa4   : > { %1662 = vperm.xlu1 %3109, %v1376_v61   ;;  %1657 = vperm.xlu0 %3108, %v1375_v62   ;;  %v257_v62 = vld [vmem:[%s5305_s1 + $0x138] sm:$0xff] }
  0xa5   : > { %2764 = vmatmul.mubr.msk.f32.gmra.mrb[50].mxu0 %vm294_vm0, %v243_v0  ;;  %2973 = vmatmul.mubr.msk.f32.gmra.mrb[50].mxu1 %vm294_vm0, %v237_v38  ;;  %v252_v38 = vld [vmem:[%s5305_s1 + $0x110] sm:$0xff] }
  0xa6   : > { %707 = vmatprep.mubr.f32.mxu0 %v3180_v1  ;;  %2975 = vmatprep.mubr.msk.f32.mxu1 %vm294_vm0, %v238_v44 }
  0xa8   : > { %1672 = vperm.xlu1 %3109, %v1378_v2   ;;  %1667 = vperm.xlu0 %3108, %v1377_v3   ;;  %v1910_v2 = vld [vmem:[%s5307_s3 + $0x68] sm:$0xff]  ;;  %v1909_v3 = vld [vmem:[%s5307_s3 + $0x60] sm:$0xff] }
  0xa9   : > { %2765 = vmatmul.mubr.msk.f32.gmra.mrb[52].mxu0 %vm294_vm0, %v244_v5  ;;  %2976 = vmatmul.mubr.msk.f32.gmra.mrb[52].mxu1 %vm294_vm0, %v239_v48  ;;  %v254_v48 = vld [vmem:[%s5305_s1 + $0x120] sm:$0xff] }
  0xaa   : > { %713 = vmatprep.mubr.f32.mxu0 %v3180_v1  ;;  %2978 = vmatprep.mubr.msk.f32.mxu1 %vm294_vm0, %v240_v52 }
  0xac   : > { %1682 = vperm.xlu1 %3109, %v1380_v6   ;;  %1677 = vperm.xlu0 %3108, %v1379_v7   ;;  %v259_v7 = vld [vmem:[%s5305_s1 + $0x148] sm:$0xff] }
  0xad   : > { %2766 = vmatmul.mubr.msk.f32.gmra.mrb[54].mxu0 %vm294_vm0, %v245_v9  ;;  %2979 = vmatmul.mubr.msk.f32.gmra.mrb[54].mxu1 %vm294_vm0, %v241_v56  ;;  %v256_v56 = vld [vmem:[%s5305_s1 + $0x130] sm:$0xff] }
  0xae   : > { %719 = vmatprep.mubr.f32.mxu0 %v3180_v1  ;;  %2981 = vmatprep.mubr.msk.f32.mxu1 %vm294_vm0, %v242_v60 }
  0xb0   : > { %1692 = vperm.xlu1 %3109, %v1382_v10   ;;  %1687 = vperm.xlu0 %3108, %v1381_v11   ;;  %v1912_v10 = vld [vmem:[%s5307_s3 + $0x78] sm:$0xff]  ;;  %v1911_v11 = vld [vmem:[%s5307_s3 + $0x70] sm:$0xff] }
  0xb1   : > { %2767 = vmatmul.mubr.msk.f32.gmra.mrb[56].mxu0 %vm294_vm0, %v246_v13  ;;  %2982 = vmatmul.mubr.msk.f32.gmra.mrb[56].mxu1 %vm294_vm0, %v243_v0  ;;  %v258_v0 = vld [vmem:[%s5305_s1 + $0x140] sm:$0xff] }
  0xb2   : > { %725 = vmatprep.mubr.f32.mxu0 %v3180_v1  ;;  %2984 = vmatprep.mubr.msk.f32.mxu1 %vm294_vm0, %v244_v5 }
  0xb4   : > { %1702 = vperm.xlu1 %3109, %v1384_v14   ;;  %1697 = vperm.xlu0 %3108, %v1383_v15   ;;  %v4035_v15 = vld [vmem:[%s5305_s1 + $0x158] sm:$0xff] }
  0xb5   : > { %2768 = vmatmul.mubr.msk.f32.gmra.mrb[58].mxu0 %vm294_vm0, %v247_v17  ;;  %2985 = vmatmul.mubr.msk.f32.gmra.mrb[58].mxu1 %vm294_vm0, %v245_v9  ;;  %v4015_v9 = vld [vmem:[%s5305_s1 + $0x150] sm:$0xff] }
  0xb6   : > { %731 = vmatprep.mubr.f32.mxu0 %v3180_v1  ;;  %2987 = vmatprep.mubr.msk.f32.mxu1 %vm294_vm0, %v246_v13 }
  0xb7   : > { %v3886_v21 = vpop.permute.xlu1 %1397  ;;  %v3888_v22 = vpop.permute.xlu0 %1387 }
  0xb8   : > { %1968 = vperm.xlu1 %3109, %v1898_v18   ;;  %1963 = vperm.xlu0 %3108, %v1897_v19   ;;  %v1914_v18 = vld [vmem:[%s5307_s3 + $0x88] sm:$0xff]  ;;  %v1913_v19 = vld [vmem:[%s5307_s3 + $0x80] sm:$0xff] }
  0xb9   : > { %2769 = vmatmul.mubr.msk.f32.gmra.mrb[60].mxu0 %vm294_vm0, %v248_v25  ;;  %2988 = vmatmul.mubr.msk.f32.gmra.mrb[60].mxu1 %vm294_vm0, %v247_v17  ;;  %v4040_v17 = vld [vmem:[%s5305_s1 + $0x160] sm:$0xff] }
  0xba   : > { %737 = vmatprep.mubr.f32.mxu0 %v3180_v1  ;;  %2990 = vmatprep.mubr.msk.f32.mxu1 %vm294_vm0, %v248_v25 }
  0xbb   : > { %v3903_v31 = vpop.permute.xlu1 %1402  ;;  %v3905_v34 = vpop.permute.xlu0 %1392 }
  0xbc   : > { %1978 = vperm.xlu1 %3109, %v1900_v29   ;;  %1973 = vperm.xlu0 %3108, %v1899_v30   ;;  %v4061_v30 = vld [vmem:[%s5305_s1 + $0x168] sm:$0xff] }
  0xbd   : > { %2770 = vmatmul.mubr.msk.f32.gmra.mrb[62].mxu0 %vm294_vm0, %v249_v35  ;;  %2991 = vmatmul.mubr.msk.f32.gmra.mrb[62].mxu1 %vm294_vm0, %v249_v35  ;;  %v4066_v35 = vld [vmem:[%s5305_s1 + $0x170] sm:$0xff] }
  0xbe   : > { %743 = vmatprep.mubr.f32.mxu0 %v3180_v1  ;;  %2993 = vmatprep.mubr.msk.f32.mxu1 %vm294_vm0, %v250_v23 }
  0xbf   : > { %v3923_v32 = vpop.permute.xlu1 %1412  ;;  %v3925_v37 = vpop.permute.xlu0 %1407 }
  0xc0   : > { %1988 = vperm.xlu1 %3109, %v1902_v36   ;;  %1983 = vperm.xlu0 %3108, %v1901_v27   ;;  %v1915_v36 = vld [vmem:[%s5307_s3 + $0x90] sm:$0xff] }
  0xc1   : > { %2771 = vmatmul.mubr.msk.f32.gmra.mrb[64].mxu0 %vm294_vm0, %v250_v23  ;;  %2994 = vmatmul.mubr.msk.f32.gmra.mrb[64].mxu1 %vm294_vm0, %v251_v40  ;;  %v1916_v23 = vld [vmem:[%s5307_s3 + $0x98] sm:$0xff] }
  0xc2   : > { %749 = vmatprep.mubr.f32.mxu0 %v3180_v1  ;;  %2996 = vmatprep.mubr.msk.f32.mxu1 %vm294_vm0, %v252_v38 }
  0xc3   : > { %v3943_v44 = vpop.permute.xlu1 %1422  ;;  %v3945_v45 = vpop.permute.xlu0 %1417 }
  0xc4   : > { %1998 = vperm.xlu1 %3109, %v1904_v41   ;;  %1993 = vperm.xlu0 %3108, %v1903_v42   ;;  %v1918_v41 = vld [vmem:[%s5307_s3 + $0xa8] sm:$0xff]  ;;  %v1917_v42 = vld [vmem:[%s5307_s3 + $0xa0] sm:$0xff] }
  0xc5   : > { %2772 = vmatmul.mubr.msk.f32.gmra.mrb[66].mxu0 %vm294_vm0, %v251_v40  ;;  %2997 = vmatmul.mubr.msk.f32.gmra.mrb[66].mxu1 %vm294_vm0, %v253_v46 }
  0xc6   : > { %755 = vmatprep.mubr.f32.mxu0 %v3180_v1  ;;  %2999 = vmatprep.mubr.msk.f32.mxu1 %vm294_vm0, %v254_v48 }
  0xc7   : > { %v3963_v52 = vpop.permute.xlu1 %1432  ;;  %v3965_v53 = vpop.permute.xlu0 %1427 }
  0xc8   : > { %2008 = vperm.xlu1 %3109, %v1906_v49   ;;  %2003 = vperm.xlu0 %3108, %v1905_v50   ;;  %v1920_v49 = vld [vmem:[%s5307_s3 + $0xb8] sm:$0xff]  ;;  %v1919_v50 = vld [vmem:[%s5307_s3 + $0xb0] sm:$0xff] }
  0xc9   : > { %2773 = vmatmul.mubr.msk.f32.gmra.mrb[68].mxu0 %vm294_vm0, %v252_v38  ;;  %3000 = vmatmul.mubr.msk.f32.gmra.mrb[68].mxu1 %vm294_vm0, %v255_v54  ;;  %v4087_v38 = vld [vmem:[%s5305_s1 + $0x178] sm:$0xff] }
  0xca   : > { %761 = vmatprep.mubr.f32.mxu0 %v3180_v1  ;;  %3002 = vmatprep.mubr.msk.f32.mxu1 %vm294_vm0, %v256_v56 }
  0xcb   : > { %v3983_v60 = vpop.permute.xlu1 %1442  ;;  %v3985_v61 = vpop.permute.xlu0 %1437 }
  0xcc   : > { %2018 = vperm.xlu1 %3109, %v1908_v57   ;;  %2013 = vperm.xlu0 %3108, %v1907_v58   ;;  %v1921_v57 = vld [vmem:[%s5307_s3 + $0xc0] sm:$0xff] }
  0xcd   : > { %2774 = vmatmul.mubr.msk.f32.gmra.mrb[70].mxu0 %vm294_vm0, %v253_v46  ;;  %3003 = vmatmul.mubr.msk.f32.gmra.mrb[70].mxu1 %vm294_vm0, %v257_v62 }
  0xce   : > { %767 = vmatprep.mubr.f32.mxu0 %v3180_v1  ;;  %3005 = vmatprep.mubr.msk.f32.mxu1 %vm294_vm0, %v258_v0 }
  0xcf   : > { %v4003_v5 = vpop.permute.xlu1 %1452  ;;  %v4005_v6 = vpop.permute.xlu0 %1447 }
  0xd0   : > { %2028 = vperm.xlu1 %3109, %v1910_v2   ;;  %2023 = vperm.xlu0 %3108, %v1909_v3   ;;  %v1925_v2 = vld [vmem:[%s5307_s3 + $0xe0] sm:$0xff] }
  0xd1   : > { %2775 = vmatmul.mubr.msk.f32.gmra.mrb[72].mxu0 %vm294_vm0, %v254_v48  ;;  %3006 = vmatmul.mubr.msk.f32.gmra.mrb[72].mxu1 %vm294_vm0, %v259_v7 }
  0xd2   : > { %773 = vmatprep.mubr.f32.mxu0 %v3180_v1  ;;  %3008 = vmatprep.mubr.msk.f32.mxu1 %vm294_vm0, %v4015_v9 }
  0xd3   : > { %v4025_v13 = vpop.permute.xlu1 %1462  ;;  %v4027_v14 = vpop.permute.xlu0 %1457 }
  0xd4   : > { %2038 = vperm.xlu1 %3109, %v1912_v10   ;;  %2033 = vperm.xlu0 %3108, %v1911_v11   ;;  %v1929_v10 = vld [vmem:[%s5307_s3 + $0x100] sm:$0xff] }
  0xd5   : > { %2776 = vmatmul.mubr.msk.f32.gmra.mrb[74].mxu0 %vm294_vm0, %v255_v54  ;;  %3009 = vmatmul.mubr.msk.f32.gmra.mrb[74].mxu1 %vm294_vm0, %v4035_v15 }
  0xd6   : > { %779 = vmatprep.mubr.f32.mxu0 %v3180_v1  ;;  %3011 = vmatprep.mubr.msk.f32.mxu1 %vm294_vm0, %v4040_v17 }
  0xd7   : > { %v4051_v25 = vpop.permute.xlu1 %1472  ;;  %v4053_v29 = vpop.permute.xlu0 %1467 }
  0xd8   : > { %2048 = vperm.xlu1 %3109, %v1914_v18   ;;  %2043 = vperm.xlu0 %3108, %v1913_v19   ;;  %v1933_v18 = vld [vmem:[%s5307_s3 + $0x120] sm:$0xff]  ;;  %v1935_v19 = vld [vmem:[%s5307_s3 + $0x130] sm:$0xff] }
  0xd9   : > { %2777 = vmatmul.mubr.msk.f32.gmra.mrb[76].mxu0 %vm294_vm0, %v256_v56  ;;  %3012 = vmatmul.mubr.msk.f32.gmra.mrb[76].mxu1 %vm294_vm0, %v4061_v30 }
  0xda   : > { %785 = vmatprep.mubr.f32.mxu0 %v3180_v1  ;;  %3014 = vmatprep.mubr.msk.f32.mxu1 %vm294_vm0, %v4066_v35 }
  0xdb   : > { %v4077_v27 = vpop.permute.xlu1 %1482  ;;  %v4079_v40 = vpop.permute.xlu0 %1477 }
  0xdc   : > { %2058 = vperm.xlu1 %3109, %v1916_v23   ;;  %2053 = vperm.xlu0 %3108, %v1915_v36   ;;  %v1937_v23 = vld [vmem:[%s5307_s3 + $0x140] sm:$0xff] }
  0xdd   : > { %2778 = vmatmul.mubr.msk.f32.gmra.mrb[78].mxu0 %vm294_vm0, %v257_v62  ;;  %3015 = vmatmul.mubr.msk.f32.gmra.mrb[78].mxu1 %vm294_vm0, %v4087_v38  ;;  %v1923_v62 = vld [vmem:[%s5307_s3 + $0xd0] sm:$0xff] }
  0xde   : > { %791 = vmatprep.mubr.f32.mxu0 %v3180_v1  ;;  %3017 = vmatprep.mubr.msk.f32.mxu1 %vm294_vm0, %v3336_v24  ;;  %v1922_v24 = vld [vmem:[%s5307_s3 + $0xc8] sm:$0xff] }
  0xdf   : > { %v4098_v46 = vpop.permute.xlu1 %1492  ;;  %v4100_v48 = vpop.permute.xlu0 %1487 }
  0xe0   : > { %2068 = vperm.xlu1 %3109, %v1918_v41   ;;  %2063 = vperm.xlu0 %3108, %v1917_v42   ;;  %v1940_v41 = vld [vmem:[%s5307_s3 + $0x158] sm:$0xff]  ;;  %v1939_v42 = vld [vmem:[%s5307_s3 + $0x150] sm:$0xff] }
  0xe1   : > { %2779 = vmatmul.mubr.msk.f32.gmra.mrb[80].mxu0 %vm294_vm0, %v258_v0  ;;  %3018 = vmatmul.mubr.msk.f32.gmra.mrb[80].mxu1 %vm294_vm0, %v3357_v28 }
  0xe2   : > { %797 = vmatprep.mubr.f32.mxu0 %v3180_v1  ;;  %3020 = vmatprep.mubr.msk.f32.mxu1 %vm294_vm0, %v3381_v33  ;;  %v1924_v33 = vld [vmem:[%s5307_s3 + $0xd8] sm:$0xff] }
  0xe3   : > { %v4114_v54 = vpop.permute.xlu1 %1502  ;;  %v4116_v56 = vpop.permute.xlu0 %1497 }
  0xe4   : > { %2078 = vperm.xlu1 %3109, %v1920_v49   ;;  %2073 = vperm.xlu0 %3108, %v1919_v50  }
  0xe5   : > { %2780 = vmatmul.mubr.msk.f32.gmra.mrb[82].mxu0 %vm294_vm0, %v259_v7  ;;  %3021 = vmatmul.mubr.msk.f32.gmra.mrb[82].mxu1 %vm294_vm0, %v3404_v39  ;;  %v1927_v7 = vld [vmem:[%s5307_s3 + $0xf0] sm:$0xff] }
  0xe6   : > { %803 = vmatprep.mubr.f32.mxu0 %v3180_v1  ;;  %3023 = vmatprep.mubr.msk.f32.mxu1 %vm294_vm0, %v3426_v43  ;;  %v1926_v43 = vld [vmem:[%s5307_s3 + $0xe8] sm:$0xff] }
  0xe7   : > { %v4130_v28 = vpop.permute.xlu1 %1512  ;;  %v4132_v58 = vpop.permute.xlu0 %1507 }
  0xe8   : > { %2088 = vperm.xlu1 %3109, %v1922_v24   ;;  %2083 = vperm.xlu0 %3108, %v1921_v57   ;;  %v1942_v24 = vld [vmem:[%s5307_s3 + $0x168] sm:$0xff]  ;;  %v1941_v57 = vld [vmem:[%s5307_s3 + $0x160] sm:$0xff] }
  0xe9   : > { %2781 = vmatmul.mubr.msk.f32.gmra.mrb[84].mxu0 %vm294_vm0, %v4015_v9  ;;  %3024 = vmatmul.mubr.msk.f32.gmra.mrb[84].mxu1 %vm294_vm0, %v3448_v47 }
  0xea   : > { %809 = vmatprep.mubr.f32.mxu0 %v3180_v1  ;;  %3026 = vmatprep.mubr.msk.f32.mxu1 %vm294_vm0, %v3470_v51  ;;  %v1928_v51 = vld [vmem:[%s5307_s3 + $0xf8] sm:$0xff] }
  0xeb   : > { %v4147_v39 = vpop.permute.xlu1 %1522  ;;  %v4149_v0 = vpop.permute.xlu0 %1517 }
  0xec   : > { %2098 = vperm.xlu1 %3109, %v1924_v33   ;;  %2093 = vperm.xlu0 %3108, %v1923_v62  }
  0xed   : > { %2782 = vmatmul.mubr.msk.f32.gmra.mrb[86].mxu0 %vm294_vm0, %v4035_v15  ;;  %3027 = vmatmul.mubr.msk.f32.gmra.mrb[86].mxu1 %vm294_vm0, %v3492_v55  ;;  %v1931_v15 = vld [vmem:[%s5307_s3 + $0x110] sm:$0xff] }
  0xee   : > { %815 = vmatprep.mubr.f32.mxu0 %v3180_v1  ;;  %3029 = vmatprep.mubr.msk.f32.mxu1 %vm294_vm0, %v3514_v59  ;;  %v1930_v59 = vld [vmem:[%s5307_s3 + $0x108] sm:$0xff] }
  0xef   : > { %v4164_v47 = vpop.permute.xlu1 %1532  ;;  %v4166_v3 = vpop.permute.xlu0 %1527 }
  0xf0   : > { %2108 = vperm.xlu1 %3109, %v1926_v43   ;;  %2103 = vperm.xlu0 %3108, %v1925_v2   ;;  %v1944_v43 = vld [vmem:[%s5307_s3 + $0x178] sm:$0xff]  ;;  %v1943_v2 = vld [vmem:[%s5307_s3 + $0x170] sm:$0xff] }
  0xf1   : > { %2783 = vmatmul.mubr.msk.f32.gmra.mrb[88].mxu0 %vm294_vm0, %v4040_v17  ;;  %3030 = vmatmul.mubr.msk.f32.gmra.mrb[88].mxu1 %vm294_vm0, %v3536_v63 }
  0xf2   : > { %821 = vmatprep.mubr.f32.mxu0 %v3180_v1  ;;  %3032 = vmatprep.mubr.msk.f32.mxu1 %vm294_vm0, %v3558_v4  ;;  %v1932_v4 = vld [vmem:[%s5307_s3 + $0x118] sm:$0xff] }
  0xf3   : > { %v4181_v55 = vpop.permute.xlu1 %1542  ;;  %v4183_v9 = vpop.permute.xlu0 %1537 }
  0xf4   : > { %2118 = vperm.xlu1 %3109, %v1928_v51   ;;  %2113 = vperm.xlu0 %3108, %v1927_v7  }
  0xf5   : > { %2784 = vmatmul.mubr.msk.f32.gmra.mrb[90].mxu0 %vm294_vm0, %v4061_v30  ;;  %3033 = vmatmul.mubr.msk.f32.gmra.mrb[90].mxu1 %vm294_vm0, %v3580_v8 }
  0xf6   : > { %827 = vmatprep.mubr.f32.mxu0 %v3180_v1  ;;  %3035 = vmatprep.mubr.msk.f32.mxu1 %vm294_vm0, %v3602_v12  ;;  %v1934_v12 = vld [vmem:[%s5307_s3 + $0x128] sm:$0xff] }
  0xf7   : > { %v4198_v63 = vpop.permute.xlu1 %1552  ;;  %v4200_v11 = vpop.permute.xlu0 %1547 }
  0xf8   : > { %5347 = vst [vmem:[#allocation5_spill] sm:$0xff] %v4198_v63  ;;  %5348 = vst [vmem:[#allocation6_spill] sm:$0xff] %v4200_v11  ;;  %2128 = vperm.xlu1 %3109, %v1930_v59   ;;  %2123 = vperm.xlu0 %3108, %v1929_v10  }
  0xf9   : > { %2785 = vmatmul.mubr.msk.f32.gmra.mrb[92].mxu0 %vm294_vm0, %v4066_v35  ;;  %3036 = vmatmul.mubr.msk.f32.gmra.mrb[92].mxu1 %vm294_vm0, %v3624_v16 }
  0xfa   : > { %833 = vmatprep.mubr.f32.mxu0 %v3180_v1  ;;  %3038 = vmatprep.mubr.msk.f32.mxu1 %vm294_vm0, %v3646_v20  ;;  %v1936_v20 = vld [vmem:[%s5307_s3 + $0x138] sm:$0xff] }
  0xfb   : > { %v4215_v8 = vpop.permute.xlu1 %1562  ;;  %v4217_v17 = vpop.permute.xlu0 %1557 }
  0xfc   : > { %5349 = vst [vmem:[#allocation7_spill] sm:$0xff] %v4215_v8  ;;  %5350 = vst [vmem:[#allocation8_spill] sm:$0xff] %v4217_v17  ;;  %2138 = vperm.xlu1 %3109, %v1932_v4   ;;  %2133 = vperm.xlu0 %3108, %v1931_v15   ;;  %v1946_v4 = vld [vmem:[%s5307_s3 + $0x188] sm:$0xff]  ;;  %v1945_v15 = vld [vmem:[%s5307_s3 + $0x180] sm:$0xff] }
  0xfd   : > { %2786 = vmatmul.mubr.msk.f32.gmra.mrb[94].mxu0 %vm294_vm0, %v4087_v38  ;;  %3039 = vmatmul.mubr.msk.f32.gmra.mrb[94].mxu1 %vm294_vm0, %v3668_v26  ;;  %v1938_v26 = vld [vmem:[%s5307_s3 + $0x148] sm:$0xff]  ;;  %v1957_v8 = vld [vmem:[%s5307_s3 + $0x1e0] sm:$0xff] }
  0xff   : > { %v4232_v1 = vpop.permute.xlu1 %1572  ;;  %v4234_v16 = vpop.permute.xlu0 %1567 }
 0x100   : > { %5351 = vst [vmem:[#allocation9_spill] sm:$0xff] %v4232_v1  ;;  %5352 = vst [vmem:[#allocation10_spill] sm:$0xff] %v4234_v16  ;;  %2148 = vperm.xlu1 %3109, %v1934_v12   ;;  %2143 = vperm.xlu0 %3108, %v1933_v18   ;;  %v1954_v1 = vld [vmem:[%s5307_s3 + $0x1c8] sm:$0xff] }
 0x103   : > { %v4242_v30 = vpop.permute.xlu1 %1582  ;;  %v4244_v35 = vpop.permute.xlu0 %1577 }
 0x104   : > { %5353 = vst [vmem:[#allocation11_spill] sm:$0xff] %v4242_v30  ;;  %5354 = vst [vmem:[#allocation12_spill] sm:$0xff] %v4244_v35  ;;  %2158 = vperm.xlu1 %3109, %v1936_v20   ;;  %2153 = vperm.xlu0 %3108, %v1935_v19  }
 0x107   : > { %v4252_v36 = vpop.permute.xlu1 %1592  ;;  %v4254_v38 = vpop.permute.xlu0 %1587 }
 0x108   : > { %5355 = vst [vmem:[#allocation13_spill] sm:$0xff] %v4252_v36  ;;  %5356 = vst [vmem:[#allocation14_spill] sm:$0xff] %v4254_v38  ;;  %2168 = vperm.xlu1 %3109, %v1938_v26   ;;  %2163 = vperm.xlu0 %3108, %v1937_v23   ;;  %v1952_v38 = vld [vmem:[%s5307_s3 + $0x1b8] sm:$0xff]  ;;  %v1951_v36 = vld [vmem:[%s5307_s3 + $0x1b0] sm:$0xff] }
 0x10b   : > { %v4262_v49 = vpop.permute.xlu1 %1602  ;;  %v4264_v50 = vpop.permute.xlu0 %1597 }
 0x10c   : > { %5357 = vst [vmem:[#allocation15_spill] sm:$0xff] %v4262_v49  ;;  %5358 = vst [vmem:[#allocation16_spill] sm:$0xff] %v4264_v50  ;;  %2178 = vperm.xlu1 %3109, %v1940_v41   ;;  %2173 = vperm.xlu0 %3108, %v1939_v42   ;;  %v1948_v41 = vld [vmem:[%s5307_s3 + $0x198] sm:$0xff]  ;;  %v1947_v42 = vld [vmem:[%s5307_s3 + $0x190] sm:$0xff] }
 0x10f   : > { %v4272_v33 = vpop.permute.xlu1 %1612  ;;  %v4274_v62 = vpop.permute.xlu0 %1607 }
 0x110   : > { %5359 = vst [vmem:[#allocation17_spill] sm:$0xff] %v4272_v33  ;;  %5360 = vst [vmem:[#allocation18_spill] sm:$0xff] %v4274_v62  ;;  %2188 = vperm.xlu1 %3109, %v1942_v24   ;;  %2183 = vperm.xlu0 %3108, %v1941_v57  }
 0x113   : > { %v4282_v51 = vpop.permute.xlu1 %1622  ;;  %v4284_v7 = vpop.permute.xlu0 %1617 }
 0x114   : > { %5361 = vst [vmem:[#allocation19_spill] sm:$0xff] %v4282_v51  ;;  %5362 = vst [vmem:[#allocation20_spill] sm:$0xff] %v4284_v7  ;;  %2198 = vperm.xlu1 %3109, %v1944_v43   ;;  %2193 = vperm.xlu0 %3108, %v1943_v2   ;;  %v4286_v59 = vpop.f32.mrb[0].mxu0  ;;  %v4288_v10 = vpop.f32.mrb[0].mxu1  ;;  %v1950_v7 = vld [vmem:[%s5307_s3 + $0x1a8] sm:$0xff]  ;;  %v1949_v51 = vld [vmem:[%s5307_s3 + $0x1a0] sm:$0xff] }
 0x115   : > { %5363 = vst [vmem:[#allocation21_spill] sm:$0xff] %v4288_v10  ;;  %v4296_v12 = vpop.f32.mrb[1].mxu0  ;;  %v4298_v18 = vpop.f32.mrb[1].mxu1 }
 0x116   : > { %5364 = vst [vmem:[#allocation22_spill] sm:$0xff] %v4298_v18  ;;  %v1706_v18 = vmul.f32 %v3888_v22, %v4296_v12 }
 0x117   : > { %v4300_v20 = vpop.permute.xlu1 %1632  ;;  %v4302_v19 = vpop.permute.xlu0 %1627 }
 0x118   : > { %5365 = vst [vmem:[#allocation23_spill] sm:$0xff] %v4302_v19  ;;  %2208 = vperm.xlu1 %3109, %v1946_v4   ;;  %2203 = vperm.xlu0 %3108, %v1945_v15   ;;  %v4304_v26 = vpop.f32.mrb[2].mxu0  ;;  %v4306_v23 = vpop.f32.mrb[2].mxu1 }
 0x119   : > { %v4314_v24 = vpop.f32.mrb[3].mxu0  ;;  %v4316_v57 = vpop.f32.mrb[3].mxu1 }
 0x11a   : > { %5366 = vst [vmem:[#allocation24_spill] sm:$0xff] %v4316_v57 }
 0x11b   : > { %v4318_v43 = vpop.permute.xlu1 %1642  ;;  %v4320_v2 = vpop.permute.xlu0 %1637 }
 0x11c   : > { %5367 = vst [vmem:[#allocation25_spill] sm:$0xff] %v4318_v43  ;;  %5368 = vst [vmem:[#allocation26_spill] sm:$0xff] %v4320_v2  ;;  %2218 = vperm.xlu1 %3109, %v1948_v41   ;;  %2213 = vperm.xlu0 %3108, %v1947_v42   ;;  %v4322_v4 = vpop.f32.mrb[4].mxu0  ;;  %v4324_v15 = vpop.f32.mrb[4].mxu1  ;;  %v1955_v2 = vld [vmem:[%s5307_s3 + $0x1d0] sm:$0xff] }
 0x11d   : > { %5369 = vst [vmem:[#allocation27_spill] sm:$0xff] %v4324_v15  ;;  %v4332_v62 = vpop.f32.mrb[5].mxu0  ;;  %v4334_v33 = vpop.f32.mrb[5].mxu1  ;;  %v1958_v15 = vld [vmem:[%s5307_s3 + $0x1e8] sm:$0xff]  ;;  %v1959_v43 = vld [vmem:[%s5307_s3 + $0x1f0] sm:$0xff]  ;;  %v1711_v10 = vmul.f32 %v3886_v21, %v4322_v4 }
 0x11e   : > { %5370 = vst [vmem:[#allocation28_spill] sm:$0xff] %v4334_v33  ;;  %v1956_v33 = vld [vmem:[%s5307_s3 + $0x1d8] sm:$0xff]  ;;  %v1712_v63 = vmul.f32 %v3886_v21, %v4332_v62 }
 0x11f   : > { %v4336_v50 = vpop.permute.xlu1 %1652  ;;  %v4338_v41 = vpop.permute.xlu0 %1647 }
 0x120   : > { %5371 = vst [vmem:[#allocation29_spill] sm:$0xff] %v4336_v50  ;;  %5372 = vst [vmem:[#allocation30_spill] sm:$0xff] %v4338_v41  ;;  %2228 = vperm.xlu1 %3109, %v1950_v7   ;;  %2223 = vperm.xlu0 %3108, %v1949_v51   ;;  %v4340_v42 = vpop.f32.mrb[6].mxu0  ;;  %v4342_v49 = vpop.f32.mrb[6].mxu1  ;;  %v1953_v50 = vld [vmem:[%s5307_s3 + $0x1c0] sm:$0xff] }
 0x121   : > { %5373 = vst [vmem:[#allocation31_spill] sm:$0xff] %v4342_v49  ;;  %v4350_v35 = vpop.f32.mrb[7].mxu0  ;;  %v4352_v30 = vpop.f32.mrb[7].mxu1  ;;  %v1705_v49 = vmul.f32 %v3888_v22, %v4286_v59  ;;  %v1714_v11 = vmul.f32 %v3903_v31, %v4340_v42 }
 0x122   : > { %5374 = vst [vmem:[#allocation32_spill] sm:$0xff] %v4352_v30  ;;  %v1960_v30 = vld [vmem:[%s5307_s3 + $0x1f8] sm:$0xff] }
 0x123   : > { %v4354_v16 = vpop.permute.xlu1 %1662  ;;  %v4356_v7 = vpop.permute.xlu0 %1657 }
 0x124   : > { %5375 = vst [vmem:[#allocation33_spill] sm:$0xff] %v4354_v16  ;;  %5376 = vst [vmem:[#allocation34_spill] sm:$0xff] %v4356_v7  ;;  %2238 = vperm.xlu1 %3109, %v1952_v38   ;;  %2233 = vperm.xlu0 %3108, %v1951_v36   ;;  %v4358_v51 = vpop.f32.mrb[8].mxu0  ;;  %v4360_v41 = vpop.f32.mrb[8].mxu1 }
 0x125   : > { %5377 = vst [vmem:[#allocation35_spill] sm:$0xff] %v4360_v41  ;;  %v4368_v17 = vpop.f32.mrb[9].mxu0  ;;  %v4370_v16 = vpop.f32.mrb[9].mxu1 }
 0x126   : > { %5378 = vst [vmem:[#allocation36_spill] sm:$0xff] %v4370_v16 }
 0x127   : > { %v4372_v7 = vpop.permute.xlu1 %1672  ;;  %v4374_v36 = vpop.permute.xlu0 %1667 }
 0x128   : > { %5379 = vst [vmem:[#allocation37_spill] sm:$0xff] %v4372_v7  ;;  %5380 = vst [vmem:[#allocation38_spill] sm:$0xff] %v4374_v36  ;;  %2248 = vperm.xlu1 %3109, %v1954_v1   ;;  %2243 = vperm.xlu0 %3108, %v1953_v50   ;;  %v4376_v38 = vpop.f32.mrb[10].mxu0  ;;  %v4378_v41 = vpop.f32.mrb[10].mxu1 }
 0x129   : > { %5381 = vst [vmem:[#allocation39_spill] sm:$0xff] %v4378_v41  ;;  %v4386_v16 = vpop.f32.mrb[11].mxu0  ;;  %v4388_v7 = vpop.f32.mrb[11].mxu1 }
 0x12a   : > { %5382 = vst [vmem:[#allocation40_spill] sm:$0xff] %v4388_v7 }
 0x12b   : > { %v4390_v36 = vpop.permute.xlu1 %1682  ;;  %v4392_v1 = vpop.permute.xlu0 %1677 }
 0x12c   : > { %5383 = vst [vmem:[#allocation41_spill] sm:$0xff] %v4390_v36  ;;  %5384 = vst [vmem:[#allocation42_spill] sm:$0xff] %v4392_v1  ;;  %2258 = vperm.xlu1 %3109, %v1956_v33   ;;  %2253 = vperm.xlu0 %3108, %v1955_v2   ;;  %v4395_v50 = vpop.f32.mrb[12].mxu0  ;;  %v4397_v41 = vpop.f32.mrb[12].mxu1 }
 0x12d   : > { %5385 = vst [vmem:[#allocation43_spill] sm:$0xff] %v4397_v41  ;;  %v4405_v7 = vpop.f32.mrb[13].mxu0  ;;  %v4407_v36 = vpop.f32.mrb[13].mxu1 }
 0x12e   : > { %5386 = vst [vmem:[#allocation44_spill] sm:$0xff] %v4407_v36 }
 0x12f   : > { %v4409_v1 = vpop.permute.xlu1 %1692  ;;  %v4411_v33 = vpop.permute.xlu0 %1687 }
 0x130   : > { %5387 = vst [vmem:[#allocation45_spill] sm:$0xff] %v4409_v1  ;;  %5388 = vst [vmem:[#allocation46_spill] sm:$0xff] %v4411_v33  ;;  %2268 = vperm.xlu1 %3109, %v1958_v15   ;;  %2263 = vperm.xlu0 %3108, %v1957_v8   ;;  %v4414_v2 = vpop.f32.mrb[14].mxu0  ;;  %v4416_v41 = vpop.f32.mrb[14].mxu1 }
 0x131   : > { %5389 = vst [vmem:[#allocation47_spill] sm:$0xff] %v4416_v41  ;;  %v4424_v36 = vpop.f32.mrb[15].mxu0  ;;  %v4426_v1 = vpop.f32.mrb[15].mxu1 }
 0x132   : > { %5390 = vst [vmem:[#allocation48_spill] sm:$0xff] %v4426_v1  ;;  %v1708_v1 = vmul.f32 %v3905_v34, %v4304_v26 }
 0x133   : > { %v4428_v33 = vpop.permute.xlu1 %1702  ;;  %v4430_v15 = vpop.permute.xlu0 %1697 }
 0x134   : > { %5391 = vst [vmem:[#allocation49_spill] sm:$0xff] %v4428_v33  ;;  %5392 = vst [vmem:[#allocation50_spill] sm:$0xff] %v4430_v15  ;;  %2278 = vperm.xlu1 %3109, %v1960_v30   ;;  %2273 = vperm.xlu0 %3108, %v1959_v43   ;;  %v4432_v8 = vpop.f32.mrb[16].mxu0  ;;  %v4434_v41 = vpop.f32.mrb[16].mxu1  ;;  %v1709_v33 = vmul.f32 %v3905_v34, %v4314_v24 }
 0x135   : > { %5393 = vst [vmem:[#allocation51_spill] sm:$0xff] %v4434_v41  ;;  %v4444_v15 = vpop.f32.mrb[17].mxu0  ;;  %v4446_v30 = vpop.f32.mrb[17].mxu1 }
 0x136   : > { %5394 = vst [vmem:[#allocation52_spill] sm:$0xff] %v4446_v30 }
 0x137   : > { %v4453_v59 = vpop.permute.xlu1 %1968  ;;  %v4455_v12 = vpop.permute.xlu0 %1963 }
 0x138   : > { %v2284_v26 = vadd.f32 %v4453_v59, %v1708_v1  ;;  %v2285_v24 = vadd.f32 %v4453_v59, %v1709_v33  ;;  %v2281_v43 = vadd.f32 %v4455_v12, %v1705_v49  ;;  %v2282_v30 = vadd.f32 %v4455_v12, %v1706_v18  ;;  %v607_v41 = vpop.f32.mrb[18].mxu0  ;;  %v4461_v19 = vpop.f32.mrb[18].mxu1 }
 0x139   : > { %5395 = vst [vmem:[#allocation53_spill] sm:$0xff] %v4461_v19  ;;  %v1715_v1 = vmul.f32 %v3903_v31, %v4350_v35  ;;  %v609_v49 = vpop.f32.mrb[19].mxu0  ;;  %v4475_v18 = vpop.f32.mrb[19].mxu1  ;;  %v1720_v19 = vmul.f32 %v3923_v32, %v4376_v38 }
 0x13a   : > { %2477 = vst [vmem:[%s4451_s13 + $0x18] sm:$0xff] %v2284_v26  ;;  %2478 = vst [vmem:[%s4451_s13 + $0x20] sm:$0xff] %v2285_v24  ;;  %v1733_v57 = vmul.f32 %v3963_v52, %v609_v49 }
 0x13b   : > { %2473 = vst [vmem:[%s4451_s13] sm:$0xff] %v2281_v43  ;;  %2474 = vst [vmem:[%s4451_s13 + $0x8] sm:$0xff] %v2282_v30  ;;  %v4477_v4 = vpop.permute.xlu1 %1978  ;;  %v4479_v62 = vpop.permute.xlu0 %1973  ;;  %v1717_v43 = vmul.f32 %v3925_v37, %v4358_v51 }
 0x13c   : > { %5396 = vst [vmem:[#allocation54_spill] sm:$0xff] %v4475_v18  ;;  %v2290_v42 = vadd.f32 %v4477_v4, %v1714_v11  ;;  %v2291_v33 = vadd.f32 %v4477_v4, %v1715_v1  ;;  %v2287_v35 = vadd.f32 %v4479_v62, %v1711_v10  ;;  %v2288_v26 = vadd.f32 %v4479_v62, %v1712_v63  ;;  %v613_v24 = vpop.f32.mrb[20].mxu0  ;;  %v4485_v30 = vpop.f32.mrb[20].mxu1 }
 0x13d   : > { %5397 = vst [vmem:[#allocation55_spill] sm:$0xff] %v4485_v30  ;;  %v1718_v18 = vmul.f32 %v3925_v37, %v4368_v17  ;;  %v1721_v11 = vmul.f32 %v3923_v32, %v4386_v16  ;;  %v615_v63 = vpop.f32.mrb[21].mxu0  ;;  %v4499_v10 = vpop.f32.mrb[21].mxu1  ;;  %v1726_v30 = vmul.f32 %v3943_v44, %v4414_v2 }
 0x13e   : > { %2483 = vst [vmem:[%s4451_s13 + $0x48] sm:$0xff] %v2290_v42  ;;  %2484 = vst [vmem:[%s4451_s13 + $0x50] sm:$0xff] %v2291_v33 }
 0x13f   : > { %2480 = vst [vmem:[%s4451_s13 + $0x30] sm:$0xff] %v2287_v35  ;;  %2481 = vst [vmem:[%s4451_s13 + $0x38] sm:$0xff] %v2288_v26  ;;  %v4501_v51 = vpop.permute.xlu1 %1988  ;;  %v4503_v17 = vpop.permute.xlu0 %1983  ;;  %v1723_v26 = vmul.f32 %v3945_v45, %v4395_v50 }
 0x140   : > { %5398 = vst [vmem:[#allocation56_spill] sm:$0xff] %v4499_v10  ;;  %v2296_v38 = vadd.f32 %v4501_v51, %v1720_v19  ;;  %v2297_v1 = vadd.f32 %v4501_v51, %v1721_v11  ;;  %v2293_v16 = vadd.f32 %v4503_v17, %v1717_v43  ;;  %v2294_v42 = vadd.f32 %v4503_v17, %v1718_v18  ;;  %v619_v33 = vpop.f32.mrb[22].mxu0  ;;  %v4509_v35 = vpop.f32.mrb[22].mxu1 }
 0x141   : > { %5399 = vst [vmem:[#allocation57_spill] sm:$0xff] %v4509_v35  ;;  %v1724_v10 = vmul.f32 %v3945_v45, %v4405_v7  ;;  %v1727_v19 = vmul.f32 %v3943_v44, %v4424_v36  ;;  %v621_v18 = vpop.f32.mrb[23].mxu0  ;;  %v4523_v43 = vpop.f32.mrb[23].mxu1  ;;  %v1732_v35 = vmul.f32 %v3963_v52, %v607_v41 }
 0x142   : > { %2489 = vst [vmem:[%s4451_s13 + $0x78] sm:$0xff] %v2296_v38  ;;  %2490 = vst [vmem:[%s4451_s13 + $0x80] sm:$0xff] %v2297_v1 }
 0x143   : > { %2486 = vst [vmem:[%s4451_s13 + $0x60] sm:$0xff] %v2293_v16  ;;  %2487 = vst [vmem:[%s4451_s13 + $0x68] sm:$0xff] %v2294_v42  ;;  %v4525_v50 = vpop.permute.xlu1 %1998  ;;  %v4527_v7 = vpop.permute.xlu0 %1993  ;;  %v1729_v42 = vmul.f32 %v3965_v53, %v4432_v8 }
 0x144   : > { %5400 = vst [vmem:[#allocation58_spill] sm:$0xff] %v4523_v43  ;;  %v2302_v2 = vadd.f32 %v4525_v50, %v1726_v30  ;;  %v2303_v11 = vadd.f32 %v4525_v50, %v1727_v19  ;;  %v2299_v36 = vadd.f32 %v4527_v7, %v1723_v26  ;;  %v2300_v38 = vadd.f32 %v4527_v7, %v1724_v10  ;;  %v625_v1 = vpop.f32.mrb[24].mxu0  ;;  %v4533_v16 = vpop.f32.mrb[24].mxu1 }
 0x145   : > { %5401 = vst [vmem:[#allocation59_spill] sm:$0xff] %v4533_v16  ;;  %v1730_v43 = vmul.f32 %v3965_v53, %v4444_v15  ;;  %v627_v30 = vpop.f32.mrb[25].mxu0  ;;  %v4545_v10 = vpop.f32.mrb[25].mxu1  ;;  %v1739_v16 = vmul.f32 %v3983_v60, %v621_v18 }
 0x146   : > { %2495 = vst [vmem:[%s4451_s13 + $0xa8] sm:$0xff] %v2302_v2  ;;  %2496 = vst [vmem:[%s4451_s13 + $0xb0] sm:$0xff] %v2303_v11 }
 0x147   : > { %2492 = vst [vmem:[%s4451_s13 + $0x90] sm:$0xff] %v2299_v36  ;;  %2493 = vst [vmem:[%s4451_s13 + $0x98] sm:$0xff] %v2300_v38  ;;  %v4547_v26 = vpop.permute.xlu1 %2008  ;;  %v4549_v8 = vpop.permute.xlu0 %2003  ;;  %v1735_v36 = vmul.f32 %v3985_v61, %v613_v24  ;;  %v1736_v38 = vmul.f32 %v3985_v61, %v615_v63 }
 0x148   : > { %5402 = vst [vmem:[#allocation60_spill] sm:$0xff] %v4545_v10  ;;  %v2308_v15 = vadd.f32 %v4547_v26, %v1732_v35  ;;  %v2309_v41 = vadd.f32 %v4547_v26, %v1733_v57  ;;  %v2305_v49 = vadd.f32 %v4549_v8, %v1729_v42  ;;  %v2306_v19 = vadd.f32 %v4549_v8, %v1730_v43  ;;  %v631_v2 = vpop.f32.mrb[26].mxu0  ;;  %v4555_v11 = vpop.f32.mrb[26].mxu1 }
 0x149   : > { %5403 = vst [vmem:[#allocation61_spill] sm:$0xff] %v4555_v11  ;;  %v1738_v10 = vmul.f32 %v3983_v60, %v619_v33  ;;  %v633_v57 = vpop.f32.mrb[27].mxu0  ;;  %v4565_v35 = vpop.f32.mrb[27].mxu1 }
 0x14a   : > { %2501 = vst [vmem:[%s4451_s13 + $0xd8] sm:$0xff] %v2308_v15  ;;  %2502 = vst [vmem:[%s4451_s13 + $0xe0] sm:$0xff] %v2309_v41  ;;  %v1745_v11 = vmul.f32 %v4003_v5, %v633_v57 }
 0x14b   : > { %2498 = vst [vmem:[%s4451_s13 + $0xc0] sm:$0xff] %v2305_v49  ;;  %2499 = vst [vmem:[%s4451_s13 + $0xc8] sm:$0xff] %v2306_v19  ;;  %v4567_v43 = vpop.permute.xlu1 %2018  ;;  %v4569_v24 = vpop.permute.xlu0 %2013  ;;  %v1741_v49 = vmul.f32 %v4005_v6, %v625_v1  ;;  %v1742_v19 = vmul.f32 %v4005_v6, %v627_v30 }
 0x14c   : > { %5404 = vst [vmem:[#allocation62_spill] sm:$0xff] %v4565_v35  ;;  %v2314_v63 = vadd.f32 %v4567_v43, %v1738_v10  ;;  %v2315_v33 = vadd.f32 %v4567_v43, %v1739_v16  ;;  %v2311_v18 = vadd.f32 %v4569_v24, %v1735_v36  ;;  %v2312_v42 = vadd.f32 %v4569_v24, %v1736_v38  ;;  %v637_v15 = vpop.f32.mrb[28].mxu0  ;;  %v4575_v41 = vpop.f32.mrb[28].mxu1 }
 0x14d   : > { %5405 = vst [vmem:[#allocation63_spill] sm:$0xff] %v4575_v41  ;;  %v1744_v35 = vmul.f32 %v4003_v5, %v631_v2  ;;  %v639_v16 = vpop.f32.mrb[29].mxu0  ;;  %v4585_v10 = vpop.f32.mrb[29].mxu1 }
 0x14e   : > { %2507 = vst [vmem:[%s4451_s13 + $0x108] sm:$0xff] %v2314_v63  ;;  %2508 = vst [vmem:[%s4451_s13 + $0x110] sm:$0xff] %v2315_v33 }
 0x14f   : > { %2504 = vst [vmem:[%s4451_s13 + $0xf0] sm:$0xff] %v2311_v18  ;;  %2505 = vst [vmem:[%s4451_s13 + $0xf8] sm:$0xff] %v2312_v42  ;;  %v4587_v36 = vpop.permute.xlu1 %2028  ;;  %v4589_v1 = vpop.permute.xlu0 %2023  ;;  %v1747_v18 = vmul.f32 %v4027_v14, %v637_v15  ;;  %v1748_v42 = vmul.f32 %v4027_v14, %v639_v16 }
 0x150   : > { %5406 = vst [vmem:[#allocation64_spill] sm:$0xff] %v4585_v10  ;;  %v2320_v30 = vadd.f32 %v4587_v36, %v1744_v35  ;;  %v2321_v2 = vadd.f32 %v4587_v36, %v1745_v11  ;;  %v2317_v38 = vadd.f32 %v4589_v1, %v1741_v49  ;;  %v2318_v57 = vadd.f32 %v4589_v1, %v1742_v19  ;;  %v643_v63 = vpop.f32.mrb[30].mxu0  ;;  %v4595_v33 = vpop.f32.mrb[30].mxu1 }
 0x151   : > { %5407 = vst [vmem:[#allocation65_spill] sm:$0xff] %v4595_v33  ;;  %v1750_v11 = vmul.f32 %v4025_v13, %v643_v63  ;;  %v645_v35 = vpop.f32.mrb[31].mxu0  ;;  %v4604_v49 = vpop.f32.mrb[31].mxu1 }
 0x152   : > { %2513 = vst [vmem:[%s4451_s13 + $0x138] sm:$0xff] %v2320_v30  ;;  %2514 = vst [vmem:[%s4451_s13 + $0x140] sm:$0xff] %v2321_v2  ;;  %v1751_v19 = vmul.f32 %v4025_v13, %v645_v35 }
 0x153   : > { %2510 = vst [vmem:[%s4451_s13 + $0x120] sm:$0xff] %v2317_v38  ;;  %2511 = vst [vmem:[%s4451_s13 + $0x128] sm:$0xff] %v2318_v57  ;;  %v4607_v10 = vpop.permute.xlu1 %2038  ;;  %v4609_v15 = vpop.permute.xlu0 %2033 }
 0x154   : > { %5408 = vst [vmem:[#allocation66_spill] sm:$0xff] %v4604_v49  ;;  %v2326_v16 = vadd.f32 %v4607_v10, %v1750_v11  ;;  %v2323_v30 = vadd.f32 %v4609_v15, %v1747_v18  ;;  %v2324_v2 = vadd.f32 %v4609_v15, %v1748_v42  ;;  %v2327_v38 = vadd.f32 %v4607_v10, %v1751_v19  ;;  %v649_v57 = vpop.f32.mrb[32].mxu0  ;;  %v2947_v63 = vpop.f32.mrb[32].mxu1 }
 0x155   : > { %v1753_v35 = vmul.f32 %v4053_v29, %v649_v57  ;;  %v1710_v41 = vmul.f32 %v2947_v63, %v3905_v34  ;;  %v651_v49 = vpop.f32.mrb[33].mxu0  ;;  %v1002_v33 = vpop.f32.mrb[33].mxu1 }
 0x156   : > { %2519 = vst [vmem:[%s4451_s13 + $0x168] sm:$0xff] %v2326_v16  ;;  %2516 = vst [vmem:[%s4451_s13 + $0x150] sm:$0xff] %v2323_v30  ;;  %v1754_v18 = vmul.f32 %v4053_v29, %v651_v49  ;;  %v1707_v42 = vmul.f32 %v3888_v22, %v1002_v33 }
 0x157   : > { %2517 = vst [vmem:[%s4451_s13 + $0x158] sm:$0xff] %v2324_v2  ;;  %2520 = vst [vmem:[%s4451_s13 + $0x170] sm:$0xff] %v2327_v38  ;;  %v4623_v11 = vpop.permute.xlu1 %2048  ;;  %v4625_v19 = vpop.permute.xlu0 %2043  ;;  %v2286_v16 = vadd.f32 %v4453_v59, %v1710_v41 }
 0x158   : > { %v2329_v30 = vadd.f32 %v4625_v19, %v1753_v35  ;;  %v2283_v34 = vadd.f32 %v4455_v12, %v1707_v42  ;;  %v2330_v2 = vadd.f32 %v4625_v19, %v1754_v18  ;;  %v655_v38 = vpop.f32.mrb[34].mxu0  ;;  %v2950_v57 = vpop.f32.mrb[34].mxu1 }
 0x159   : > { %2479 = vst.msk [vmem:[%s4451_s13 + $0x28] sm:$0xff] %vm2475_vm1, %v2286_v16  ;;  %v1756_v22 = vmul.f32 %v4051_v25, %v655_v38  ;;  %v1716_v33 = vmul.f32 %v2950_v57, %v3903_v31  ;;  %v657_v49 = vpop.f32.mrb[35].mxu0  ;;  %v1012_v63 = vpop.f32.mrb[35].mxu1 }
 0x15a   : > { %2522 = vst [vmem:[%s4451_s13 + $0x180] sm:$0xff] %v2329_v30  ;;  %2476 = vst.msk [vmem:[%s4451_s13 + $0x10] sm:$0xff] %vm2475_vm1, %v2283_v34  ;;  %v1757_v59 = vmul.f32 %v4051_v25, %v657_v49  ;;  %v1713_v12 = vmul.f32 %v3886_v21, %v1012_v63 }
 0x15b   : > { %2523 = vst [vmem:[%s4451_s13 + $0x188] sm:$0xff] %v2330_v2  ;;  %v4641_v41 = vpop.permute.xlu1 %2058  ;;  %v4643_v35 = vpop.permute.xlu0 %2053  ;;  %v2332_v18 = vadd.f32 %v4623_v11, %v1756_v22  ;;  %v2292_v31 = vadd.f32 %v4477_v4, %v1716_v33 }
 0x15c   : > { %v2333_v42 = vadd.f32 %v4623_v11, %v1757_v59  ;;  %v2289_v16 = vadd.f32 %v4479_v62, %v1713_v12  ;;  %v661_v30 = vpop.f32.mrb[36].mxu0  ;;  %v2953_v34 = vpop.f32.mrb[36].mxu1 }
 0x15d   : > { %2525 = vst [vmem:[%s4451_s13 + $0x198] sm:$0xff] %v2332_v18  ;;  %2485 = vst.msk [vmem:[%s4451_s13 + $0x58] sm:$0xff] %vm2475_vm1, %v2292_v31  ;;  %v1759_v21 = vmul.f32 %v4079_v40, %v661_v30  ;;  %v1722_v2 = vmul.f32 %v2953_v34, %v3923_v32  ;;  %v663_v38 = vpop.f32.mrb[37].mxu0  ;;  %v1022_v57 = vpop.f32.mrb[37].mxu1 }
 0x15e   : > { %2526 = vst [vmem:[%s4451_s13 + $0x1a0] sm:$0xff] %v2333_v42  ;;  %2482 = vst.msk [vmem:[%s4451_s13 + $0x40] sm:$0xff] %vm2475_vm1, %v2289_v16  ;;  %v1760_v4 = vmul.f32 %v4079_v40, %v663_v38  ;;  %v1719_v62 = vmul.f32 %v3925_v37, %v1022_v57 }
 0x15f   : > { %v4659_v22 = vpop.permute.xlu1 %2068  ;;  %v4661_v33 = vpop.permute.xlu0 %2063  ;;  %v2335_v49 = vadd.f32 %v4643_v35, %v1759_v21  ;;  %v2298_v32 = vadd.f32 %v4501_v51, %v1722_v2 }
 0x160   : > { %v2336_v63 = vadd.f32 %v4643_v35, %v1760_v4  ;;  %v2295_v59 = vadd.f32 %v4503_v17, %v1719_v62  ;;  %v667_v12 = vpop.f32.mrb[38].mxu0  ;;  %v2956_v18 = vpop.f32.mrb[38].mxu1 }
 0x161   : > { %2528 = vst [vmem:[%s4451_s13 + $0x1b0] sm:$0xff] %v2335_v49  ;;  %2491 = vst.msk [vmem:[%s4451_s13 + $0x88] sm:$0xff] %vm2475_vm1, %v2298_v32  ;;  %v1762_v37 = vmul.f32 %v4077_v27, %v667_v12  ;;  %v1728_v31 = vmul.f32 %v2956_v18, %v3943_v44  ;;  %v669_v42 = vpop.f32.mrb[39].mxu0  ;;  %v1032_v16 = vpop.f32.mrb[39].mxu1 }
 0x162   : > { %2529 = vst [vmem:[%s4451_s13 + $0x1b8] sm:$0xff] %v2336_v63  ;;  %2488 = vst.msk [vmem:[%s4451_s13 + $0x70] sm:$0xff] %vm2475_vm1, %v2295_v59  ;;  %v1763_v51 = vmul.f32 %v4077_v27, %v669_v42  ;;  %v1725_v17 = vmul.f32 %v3945_v45, %v1032_v16 }
 0x163   : > { %v4677_v30 = vpop.permute.xlu1 %2078  ;;  %v4679_v34 = vpop.permute.xlu0 %2073  ;;  %v2338_v21 = vadd.f32 %v4641_v41, %v1762_v37  ;;  %v2304_v44 = vadd.f32 %v4525_v50, %v1728_v31 }
 0x164   : > { %v2339_v2 = vadd.f32 %v4641_v41, %v1763_v51  ;;  %v2301_v38 = vadd.f32 %v4527_v7, %v1725_v17  ;;  %v673_v57 = vpop.f32.mrb[40].mxu0  ;;  %v2959_v4 = vpop.f32.mrb[40].mxu1 }
 0x165   : > { %2531 = vst [vmem:[%s4451_s13 + $0x1c8] sm:$0xff] %v2338_v21  ;;  %2497 = vst.msk [vmem:[%s4451_s13 + $0xb8] sm:$0xff] %vm2475_vm1, %v2304_v44  ;;  %v1765_v45 = vmul.f32 %v4100_v48, %v673_v57  ;;  %v1734_v62 = vmul.f32 %v2959_v4, %v3963_v52  ;;  %v675_v49 = vpop.f32.mrb[41].mxu0  ;;  %v1042_v32 = vpop.f32.mrb[41].mxu1 }
 0x166   : > { %2532 = vst [vmem:[%s4451_s13 + $0x1d0] sm:$0xff] %v2339_v2  ;;  %2494 = vst.msk [vmem:[%s4451_s13 + $0xa0] sm:$0xff] %vm2475_vm1, %v2301_v38  ;;  %v1766_v50 = vmul.f32 %v4100_v48, %v675_v49  ;;  %v1731_v7 = vmul.f32 %v3965_v53, %v1042_v32 }
 0x167   : > { %v4695_v63 = vpop.permute.xlu1 %2088  ;;  %v4697_v59 = vpop.permute.xlu0 %2083  ;;  %v2341_v12 = vadd.f32 %v4661_v33, %v1765_v45  ;;  %v2310_v52 = vadd.f32 %v4547_v26, %v1734_v62 }
 0x168   : > { %v2342_v18 = vadd.f32 %v4661_v33, %v1766_v50  ;;  %v2307_v37 = vadd.f32 %v4549_v8, %v1731_v7  ;;  %v679_v31 = vpop.f32.mrb[42].mxu0  ;;  %v2962_v42 = vpop.f32.mrb[42].mxu1 }
 0x169   : > { %2534 = vst [vmem:[%s4451_s13 + $0x1e0] sm:$0xff] %v2341_v12  ;;  %2503 = vst.msk [vmem:[%s4451_s13 + $0xe8] sm:$0xff] %vm2475_vm1, %v2310_v52  ;;  %v1768_v53 = vmul.f32 %v4098_v46, %v679_v31  ;;  %v1740_v16 = vmul.f32 %v2962_v42, %v3983_v60  ;;  %v681_v51 = vpop.f32.mrb[43].mxu0  ;;  %v1052_v17 = vpop.f32.mrb[43].mxu1 }
 0x16a   : > { %2535 = vst [vmem:[%s4451_s13 + $0x1e8] sm:$0xff] %v2342_v18  ;;  %2500 = vst.msk [vmem:[%s4451_s13 + $0xd0] sm:$0xff] %vm2475_vm1, %v2307_v37  ;;  %v1769_v26 = vmul.f32 %v4098_v46, %v681_v51  ;;  %v1737_v8 = vmul.f32 %v3985_v61, %v1052_v17 }
 0x16b   : > { %v4713_v21 = vpop.permute.xlu1 %2098  ;;  %v4715_v44 = vpop.permute.xlu0 %2093  ;;  %v2344_v2 = vadd.f32 %v4659_v22, %v1768_v53  ;;  %v2316_v60 = vadd.f32 %v4567_v43, %v1740_v16 }
 0x16c   : > { %v2345_v38 = vadd.f32 %v4659_v22, %v1769_v26  ;;  %v2313_v57 = vadd.f32 %v4569_v24, %v1737_v8  ;;  %v685_v4 = vpop.f32.mrb[44].mxu0  ;;  %v2965_v45 = vpop.f32.mrb[44].mxu1 }
 0x16d   : > { %2537 = vst [vmem:[%s4451_s13 + $0x1f8] sm:$0xff] %v2344_v2  ;;  %2509 = vst.msk [vmem:[%s4451_s13 + $0x118] sm:$0xff] %vm2475_vm1, %v2316_v60  ;;  %v1771_v61 = vmul.f32 %v4116_v56, %v685_v4  ;;  %v1746_v62 = vmul.f32 %v2965_v45, %v4003_v5  ;;  %v687_v49 = vpop.f32.mrb[45].mxu0  ;;  %v1062_v32 = vpop.f32.mrb[45].mxu1 }
 0x16e   : > { %2538 = vst [vmem:[%s4451_s13 + $0x200] sm:$0xff] %v2345_v38  ;;  %2506 = vst.msk [vmem:[%s4451_s13 + $0x100] sm:$0xff] %vm2475_vm1, %v2313_v57  ;;  %v1772_v43 = vmul.f32 %v4116_v56, %v687_v49  ;;  %v1743_v24 = vmul.f32 %v4005_v6, %v1062_v32 }
 0x16f   : > { %v4731_v50 = vpop.permute.xlu1 %2108  ;;  %v4733_v7 = vpop.permute.xlu0 %2103  ;;  %v2347_v12 = vadd.f32 %v4679_v34, %v1771_v61  ;;  %v2322_v5 = vadd.f32 %v4587_v36, %v1746_v62 }
 0x170   : > { %v2348_v52 = vadd.f32 %v4679_v34, %v1772_v43  ;;  %v2319_v18 = vadd.f32 %v4589_v1, %v1743_v24  ;;  %v691_v37 = vpop.f32.mrb[46].mxu0  ;;  %v2968_v31 = vpop.f32.mrb[46].mxu1 }
 0x171   : > { %2540 = vst [vmem:[%s4451_s13 + $0x210] sm:$0xff] %v2347_v12  ;;  %2515 = vst.msk [vmem:[%s4451_s13 + $0x148] sm:$0xff] %vm2475_vm1, %v2322_v5  ;;  %v1774_v6 = vmul.f32 %v4114_v54, %v691_v37  ;;  %v1752_v42 = vmul.f32 %v2968_v31, %v4025_v13  ;;  %v693_v53 = vpop.f32.mrb[47].mxu0  ;;  %v1072_v16 = vpop.f32.mrb[47].mxu1 }
 0x172   : > { %2541 = vst [vmem:[%s4451_s13 + $0x218] sm:$0xff] %v2348_v52  ;;  %2512 = vst.msk [vmem:[%s4451_s13 + $0x130] sm:$0xff] %vm2475_vm1, %v2319_v18  ;;  %v1775_v36 = vmul.f32 %v4114_v54, %v693_v53  ;;  %v1749_v1 = vmul.f32 %v4027_v14, %v1072_v16 }
 0x173   : > { %v4749_v51 = vpop.permute.xlu1 %2118  ;;  %v4751_v17 = vpop.permute.xlu0 %2113  ;;  %v2350_v26 = vadd.f32 %v4677_v30, %v1774_v6  ;;  %v2328_v13 = vadd.f32 %v4607_v10, %v1752_v42 }
 0x174   : > { %v2351_v8 = vadd.f32 %v4677_v30, %v1775_v36  ;;  %v2325_v2 = vadd.f32 %v4609_v15, %v1749_v1  ;;  %v697_v60 = vpop.f32.mrb[48].mxu0  ;;  %v2971_v38 = vpop.f32.mrb[48].mxu1 }
 0x175   : > { %2543 = vst [vmem:[%s4451_s13 + $0x228] sm:$0xff] %v2350_v26  ;;  %2521 = vst.msk [vmem:[%s4451_s13 + $0x178] sm:$0xff] %vm2475_vm1, %v2328_v13  ;;  %v1777_v14 = vmul.f32 %v4132_v58, %v697_v60  ;;  %v1758_v57 = vmul.f32 %v2971_v38, %v4051_v25  ;;  %v699_v4 = vpop.f32.mrb[49].mxu0  ;;  %v1082_v45 = vpop.f32.mrb[49].mxu1 }
 0x176   : > { %2544 = vst [vmem:[%s4451_s13 + $0x230] sm:$0xff] %v2351_v8  ;;  %2518 = vst.msk [vmem:[%s4451_s13 + $0x160] sm:$0xff] %vm2475_vm1, %v2325_v2  ;;  %v1778_v10 = vmul.f32 %v4132_v58, %v699_v4  ;;  %v1755_v15 = vmul.f32 %v4053_v29, %v1082_v45 }
 0x177   : > { %v4767_v61 = vpop.permute.xlu1 %2128  ;;  %v4769_v62 = vpop.permute.xlu0 %2123  ;;  %v2353_v49 = vadd.f32 %v4697_v59, %v1777_v14  ;;  %v2334_v25 = vadd.f32 %v4623_v11, %v1758_v57 }
 0x178   : > { %v2354_v32 = vadd.f32 %v4697_v59, %v1778_v10  ;;  %v2331_v43 = vadd.f32 %v4625_v19, %v1755_v15  ;;  %v703_v24 = vpop.f32.mrb[50].mxu0  ;;  %v2974_v12 = vpop.f32.mrb[50].mxu1 }
 0x179   : > { %2546 = vst [vmem:[%s4451_s13 + $0x240] sm:$0xff] %v2353_v49  ;;  %2527 = vst.msk [vmem:[%s4451_s13 + $0x1a8] sm:$0xff] %vm2475_vm1, %v2334_v25  ;;  %v1780_v29 = vmul.f32 %v4130_v28, %v703_v24  ;;  %v1764_v5 = vmul.f32 %v2974_v12, %v4077_v27  ;;  %v705_v52 = vpop.f32.mrb[51].mxu0  ;;  %v1092_v18 = vpop.f32.mrb[51].mxu1 }
 0x17a   : > { %2547 = vst [vmem:[%s4451_s13 + $0x248] sm:$0xff] %v2354_v32  ;;  %2524 = vst.msk [vmem:[%s4451_s13 + $0x190] sm:$0xff] %vm2475_vm1, %v2331_v43  ;;  %v1781_v11 = vmul.f32 %v4130_v28, %v705_v52  ;;  %v1761_v19 = vmul.f32 %v4079_v40, %v1092_v18 }
 0x17b   : > { %v4785_v37 = vpop.permute.xlu1 %2138  ;;  %v4787_v31 = vpop.permute.xlu0 %2133  ;;  %v2356_v6 = vadd.f32 %v4695_v63, %v1780_v29  ;;  %v2340_v27 = vadd.f32 %v4641_v41, %v1764_v5 }
 0x17c   : > { %v2357_v42 = vadd.f32 %v4695_v63, %v1781_v11  ;;  %v2337_v53 = vadd.f32 %v4643_v35, %v1761_v19  ;;  %v709_v16 = vpop.f32.mrb[52].mxu0  ;;  %v2977_v36 = vpop.f32.mrb[52].mxu1 }
 0x17d   : > { %2549 = vst [vmem:[%s4451_s13 + $0x258] sm:$0xff] %v2356_v6  ;;  %2533 = vst.msk [vmem:[%s4451_s13 + $0x1d8] sm:$0xff] %vm2475_vm1, %v2340_v27  ;;  %v1783_v40 = vmul.f32 %v4149_v0, %v709_v16  ;;  %v1770_v1 = vmul.f32 %v2977_v36, %v4098_v46  ;;  %v711_v26 = vpop.f32.mrb[53].mxu0  ;;  %v1102_v13 = vpop.f32.mrb[53].mxu1 }
 0x17e   : > { %2550 = vst [vmem:[%s4451_s13 + $0x260] sm:$0xff] %v2357_v42  ;;  %2530 = vst.msk [vmem:[%s4451_s13 + $0x1c0] sm:$0xff] %vm2475_vm1, %v2337_v53  ;;  %v1784_v41 = vmul.f32 %v4149_v0, %v711_v26  ;;  %v1767_v35 = vmul.f32 %v4100_v48, %v1102_v13 }
 0x17f   : > { %v4803_v8 = vpop.permute.xlu1 %2148  ;;  %v4805_v2 = vpop.permute.xlu0 %2143  ;;  %v2359_v60 = vadd.f32 %v4715_v44, %v1783_v40  ;;  %v2346_v46 = vadd.f32 %v4659_v22, %v1770_v1 }
 0x180   : > { %v2360_v38 = vadd.f32 %v4715_v44, %v1784_v41  ;;  %v2343_v14 = vadd.f32 %v4661_v33, %v1767_v35  ;;  %v715_v57 = vpop.f32.mrb[54].mxu0  ;;  %v2980_v4 = vpop.f32.mrb[54].mxu1 }
 0x181   : > { %2552 = vst [vmem:[%s4451_s13 + $0x270] sm:$0xff] %v2359_v60  ;;  %2539 = vst.msk [vmem:[%s4451_s13 + $0x208] sm:$0xff] %vm2475_vm1, %v2346_v46  ;;  %v1786_v48 = vmul.f32 %v4147_v39, %v715_v57  ;;  %v1776_v45 = vmul.f32 %v2980_v4, %v4114_v54  ;;  %v717_v10 = vpop.f32.mrb[55].mxu0  ;;  %v1112_v15 = vpop.f32.mrb[55].mxu1 }
 0x182   : > { %2553 = vst [vmem:[%s4451_s13 + $0x278] sm:$0xff] %v2360_v38  ;;  %2536 = vst.msk [vmem:[%s4451_s13 + $0x1f0] sm:$0xff] %vm2475_vm1, %v2343_v14  ;;  %v1787_v22 = vmul.f32 %v4147_v39, %v717_v10  ;;  %v1773_v33 = vmul.f32 %v4116_v56, %v1112_v15 }
 0x183   : > { %v4821_v49 = vpop.permute.xlu1 %2158  ;;  %v4823_v25 = vpop.permute.xlu0 %2153  ;;  %v2362_v32 = vadd.f32 %v4713_v21, %v1786_v48  ;;  %v2352_v54 = vadd.f32 %v4677_v30, %v1776_v45 }
 0x184   : > { %v2363_v43 = vadd.f32 %v4713_v21, %v1787_v22  ;;  %v2349_v24 = vadd.f32 %v4679_v34, %v1773_v33  ;;  %v721_v12 = vpop.f32.mrb[56].mxu0  ;;  %v2983_v29 = vpop.f32.mrb[56].mxu1 }
 0x185   : > { %2555 = vst [vmem:[%s4451_s13 + $0x288] sm:$0xff] %v2362_v32  ;;  %2545 = vst.msk [vmem:[%s4451_s13 + $0x238] sm:$0xff] %vm2475_vm1, %v2352_v54  ;;  %v1789_v56 = vmul.f32 %v4166_v3, %v721_v12  ;;  %v1782_v5 = vmul.f32 %v2983_v29, %v4130_v28  ;;  %v723_v52 = vpop.f32.mrb[57].mxu0  ;;  %v1122_v18 = vpop.f32.mrb[57].mxu1 }
 0x186   : > { %2556 = vst [vmem:[%s4451_s13 + $0x290] sm:$0xff] %v2363_v43  ;;  %2542 = vst.msk [vmem:[%s4451_s13 + $0x220] sm:$0xff] %vm2475_vm1, %v2349_v24  ;;  %v1790_v30 = vmul.f32 %v4166_v3, %v723_v52  ;;  %v1779_v34 = vmul.f32 %v4132_v58, %v1122_v18 }
 0x187   : > { %v4839_v11 = vpop.permute.xlu1 %2168  ;;  %v4841_v19 = vpop.permute.xlu0 %2163  ;;  %v2365_v6 = vadd.f32 %v4733_v7, %v1789_v56  ;;  %v2358_v28 = vadd.f32 %v4695_v63, %v1782_v5 }
 0x188   : > { %v2366_v27 = vadd.f32 %v4733_v7, %v1790_v30  ;;  %v2355_v42 = vadd.f32 %v4697_v59, %v1779_v34  ;;  %v727_v53 = vpop.f32.mrb[58].mxu0  ;;  %v2986_v16 = vpop.f32.mrb[58].mxu1 }
 0x189   : > { %2558 = vst [vmem:[%s4451_s13 + $0x2a0] sm:$0xff] %v2365_v6  ;;  %2551 = vst.msk [vmem:[%s4451_s13 + $0x268] sm:$0xff] %vm2475_vm1, %v2358_v28  ;;  %v1792_v58 = vmul.f32 %v4164_v47, %v727_v53  ;;  %v1788_v36 = vmul.f32 %v2986_v16, %v4147_v39  ;;  %v729_v40 = vpop.f32.mrb[59].mxu0  ;;  %v1132_v1 = vpop.f32.mrb[59].mxu1  ;;  %v5410_v28 = vld [vmem:[#allocation6_spill] sm:$0xff] }
 0x18a   : > { %2559 = vst [vmem:[%s4451_s13 + $0x2a8] sm:$0xff] %v2366_v27  ;;  %2548 = vst.msk [vmem:[%s4451_s13 + $0x250] sm:$0xff] %vm2475_vm1, %v2355_v42  ;;  %v1793_v63 = vmul.f32 %v4164_v47, %v729_v40  ;;  %v1785_v59 = vmul.f32 %v4149_v0, %v1132_v1  ;;  %v5411_v42 = vld [vmem:[#allocation5_spill] sm:$0xff]  ;;  %v5414_v40 = vld [vmem:[#allocation22_spill] sm:$0xff] }
 0x18b   : > { %v4857_v26 = vpop.permute.xlu1 %2178  ;;  %v4859_v13 = vpop.permute.xlu0 %2173  ;;  %v2368_v41 = vadd.f32 %v4731_v50, %v1792_v58  ;;  %v2364_v39 = vadd.f32 %v4713_v21, %v1788_v36  ;;  %v5413_v36 = vld [vmem:[#allocation23_spill] sm:$0xff] }
 0x18c   : > { %v2369_v35 = vadd.f32 %v4731_v50, %v1793_v63  ;;  %v2361_v60 = vadd.f32 %v4715_v44, %v1785_v59  ;;  %v733_v46 = vpop.f32.mrb[60].mxu0  ;;  %v2989_v38 = vpop.f32.mrb[60].mxu1  ;;  %v1850_v1 = vmul.f32 %v5413_v36, %v5414_v40  ;;  %v5424_v40 = vld [vmem:[#allocation29_spill] sm:$0xff] }
 0x18d   : > { %2561 = vst [vmem:[%s4451_s13 + $0x2b8] sm:$0xff] %v2368_v41  ;;  %2557 = vst.msk [vmem:[%s4451_s13 + $0x298] sm:$0xff] %vm2475_vm1, %v2364_v39  ;;  %v1795_v0 = vmul.f32 %v4183_v9, %v733_v46  ;;  %v1794_v14 = vmul.f32 %v2989_v38, %v4164_v47  ;;  %v735_v57 = vpop.f32.mrb[61].mxu0  ;;  %v1142_v4 = vpop.f32.mrb[61].mxu1 }
 0x18e   : > { %2562 = vst [vmem:[%s4451_s13 + $0x2c0] sm:$0xff] %v2369_v35  ;;  %2554 = vst.msk [vmem:[%s4451_s13 + $0x280] sm:$0xff] %vm2475_vm1, %v2361_v60  ;;  %v1796_v21 = vmul.f32 %v4183_v9, %v735_v57  ;;  %v1791_v44 = vmul.f32 %v4166_v3, %v1142_v4 }
 0x18f   : > { %v4875_v48 = vpop.permute.xlu1 %2188  ;;  %v4877_v45 = vpop.permute.xlu0 %2183  ;;  %v2371_v10 = vadd.f32 %v4751_v17, %v1795_v0  ;;  %v2370_v47 = vadd.f32 %v4731_v50, %v1794_v14 }
 0x190   : > { %v2372_v15 = vadd.f32 %v4751_v17, %v1796_v21  ;;  %v2367_v22 = vadd.f32 %v4733_v7, %v1791_v44  ;;  %v739_v33 = vpop.f32.mrb[62].mxu0  ;;  %v2992_v32 = vpop.f32.mrb[62].mxu1  ;;  %v5415_v44 = vld [vmem:[#allocation31_spill] sm:$0xff] }
 0x191   : > { %2564 = vst [vmem:[%s4451_s13 + $0x2d0] sm:$0xff] %v2371_v10  ;;  %2563 = vst.msk [vmem:[%s4451_s13 + $0x2c8] sm:$0xff] %vm2475_vm1, %v2370_v47  ;;  %v1798_v3 = vmul.f32 %v4181_v55, %v739_v33  ;;  %v1800_v54 = vmul.f32 %v2992_v32, %v4181_v55  ;;  %v741_v43 = vpop.f32.mrb[63].mxu0  ;;  %v1152_v24 = vpop.f32.mrb[63].mxu1  ;;  %v5416_v10 = vld [vmem:[#allocation25_spill] sm:$0xff]  ;;  %v5418_v33 = vld [vmem:[#allocation7_spill] sm:$0xff] }
 0x192   : > { %2565 = vst [vmem:[%s4451_s13 + $0x2d8] sm:$0xff] %v2372_v15  ;;  %2560 = vst.msk [vmem:[%s4451_s13 + $0x2b0] sm:$0xff] %vm2475_vm1, %v2367_v22  ;;  %v1799_v50 = vmul.f32 %v4181_v55, %v741_v43  ;;  %v1797_v7 = vmul.f32 %v4183_v9, %v1152_v24  ;;  %v1852_v55 = vmul.f32 %v4300_v20, %v4306_v23  ;;  %v5409_v9 = vld [vmem:[#allocation24_spill] sm:$0xff]  ;;  %v5419_v43 = vld [vmem:[#allocation27_spill] sm:$0xff] }
 0x193   : > { %v4893_v12 = vpop.permute.xlu1 %2198  ;;  %v4895_v29 = vpop.permute.xlu0 %2193  ;;  %v2374_v56 = vadd.f32 %v4749_v51, %v1798_v3  ;;  %v2376_v5 = vadd.f32 %v4749_v51, %v1800_v54  ;;  %v1853_v6 = vmul.f32 %v4300_v20, %v5409_v9  ;;  %v1858_v47 = vmul.f32 %v5416_v10, %v5415_v44  ;;  %v5417_v15 = vld [vmem:[#allocation32_spill] sm:$0xff]  ;;  %v5420_v24 = vld [vmem:[#allocation26_spill] sm:$0xff] }
 0x194   : > { %v2375_v52 = vadd.f32 %v4749_v51, %v1799_v50  ;;  %v2373_v18 = vadd.f32 %v4751_v17, %v1797_v7  ;;  %v745_v30 = vpop.f32.mrb[64].mxu0  ;;  %v2995_v34 = vpop.f32.mrb[64].mxu1  ;;  %v5412_v51 = vld [vmem:[#allocation21_spill] sm:$0xff]  ;;  %v1859_v22 = vmul.f32 %v5416_v10, %v5417_v15  ;;  %v1855_v50 = vmul.f32 %v5420_v24, %v5419_v43  ;;  %v5421_v7 = vld [vmem:[#allocation28_spill] sm:$0xff]  ;;  %v5430_v44 = vld [vmem:[#allocation10_spill] sm:$0xff] }
 0x195   : > { %2567 = vst [vmem:[%s4451_s13 + $0x2e8] sm:$0xff] %v2374_v56  ;;  %2569 = vst.msk [vmem:[%s4451_s13 + $0x2f8] sm:$0xff] %vm2475_vm1, %v2376_v5  ;;  %v1801_v27 = vmul.f32 %v5410_v28, %v745_v30  ;;  %v1806_v53 = vmul.f32 %v2995_v34, %v5411_v42  ;;  %v747_v16 = vpop.f32.mrb[65].mxu0  ;;  %v1162_v58 = vpop.f32.mrb[65].mxu1  ;;  %v1849_v17 = vmul.f32 %v5413_v36, %v5412_v51 }
 0x196   : > { %2568 = vst [vmem:[%s4451_s13 + $0x2f0] sm:$0xff] %v2375_v52  ;;  %2566 = vst.msk [vmem:[%s4451_s13 + $0x2e0] sm:$0xff] %vm2475_vm1, %v2373_v18  ;;  %v1802_v23 = vmul.f32 %v5410_v28, %v747_v16  ;;  %v1803_v63 = vmul.f32 %v5410_v28, %v1162_v58  ;;  %v1856_v56 = vmul.f32 %v5420_v24, %v5421_v7  ;;  %v5422_v52 = vld [vmem:[#allocation8_spill] sm:$0xff] }
 0x197   : > { %v4919_v59 = vpop.permute.xlu1 %2208  ;;  %v4921_v41 = vpop.permute.xlu0 %2203  ;;  %v2377_v39 = vadd.f32 %v4769_v62, %v1801_v27  ;;  %v2382_v35 = vadd.f32 %v4767_v61, %v1806_v53 }
 0x198   : > { %v2428_v60 = vadd.f32 %v4919_v59, %v1852_v55  ;;  %v2429_v46 = vadd.f32 %v4919_v59, %v1853_v6  ;;  %v2378_v38 = vadd.f32 %v4769_v62, %v1802_v23  ;;  %v2379_v0 = vadd.f32 %v4769_v62, %v1803_v63  ;;  %v751_v4 = vpop.f32.mrb[66].mxu0  ;;  %v2998_v21 = vpop.f32.mrb[66].mxu1  ;;  %v5425_v23 = vld [vmem:[#allocation40_spill] sm:$0xff] }
 0x199   : > { %v2425_v14 = vadd.f32 %v4921_v41, %v1849_v17  ;;  %v2426_v57 = vadd.f32 %v4921_v41, %v1850_v1  ;;  %2570 = vst [vmem:[%s4451_s13 + $0x300] sm:$0xff] %v2377_v39  ;;  %2575 = vst.msk [vmem:[%s4451_s13 + $0x328] sm:$0xff] %vm2475_vm1, %v2382_v35  ;;  %v1804_v62 = vmul.f32 %v5411_v42, %v751_v4  ;;  %v753_v3 = vpop.f32.mrb[67].mxu0  ;;  %v1172_v54 = vpop.f32.mrb[67].mxu1  ;;  %v5423_v17 = vld [vmem:[#allocation39_spill] sm:$0xff]  ;;  %v5426_v39 = vld [vmem:[#allocation9_spill] sm:$0xff] }
 0x19a   : > { %2621 = vst [vmem:[%s4451_s13 + $0x498] sm:$0xff] %v2428_v60  ;;  %2622 = vst [vmem:[%s4451_s13 + $0x4a0] sm:$0xff] %v2429_v46  ;;  %v1812_v32 = vmul.f32 %v2998_v21, %v5418_v33  ;;  %v1805_v5 = vmul.f32 %v5411_v42, %v753_v3  ;;  %v1809_v18 = vmul.f32 %v5422_v52, %v1172_v54 }
 0x19b   : > { %2571 = vst [vmem:[%s4451_s13 + $0x308] sm:$0xff] %v2378_v38  ;;  %2572 = vst.msk [vmem:[%s4451_s13 + $0x310] sm:$0xff] %vm2475_vm1, %v2379_v0  ;;  %v4953_v30 = vpop.permute.xlu1 %2218  ;;  %v4955_v34 = vpop.permute.xlu0 %2213  ;;  %v2380_v55 = vadd.f32 %v4767_v61, %v1804_v62  ;;  %v1864_v1 = vmul.f32 %v5424_v40, %v5423_v17  ;;  %v1865_v63 = vmul.f32 %v5424_v40, %v5425_v23  ;;  %v5427_v38 = vld [vmem:[#allocation35_spill] sm:$0xff]  ;;  %v5428_v0 = vld [vmem:[#allocation30_spill] sm:$0xff] }
 0x19c   : > { %2618 = vst [vmem:[%s4451_s13 + $0x480] sm:$0xff] %v2425_v14  ;;  %2619 = vst [vmem:[%s4451_s13 + $0x488] sm:$0xff] %v2426_v57  ;;  %v2388_v9 = vadd.f32 %v4785_v37, %v1812_v32  ;;  %v2434_v6 = vadd.f32 %v4953_v30, %v1858_v47  ;;  %v2435_v28 = vadd.f32 %v4953_v30, %v1859_v22  ;;  %v757_v58 = vpop.f32.mrb[68].mxu0  ;;  %v3001_v51 = vpop.f32.mrb[68].mxu1  ;;  %v5429_v57 = vld [vmem:[#allocation36_spill] sm:$0xff] }
 0x19d   : > { %v2381_v27 = vadd.f32 %v4767_v61, %v1805_v5  ;;  %v2385_v42 = vadd.f32 %v4787_v31, %v1809_v18  ;;  %v2431_v53 = vadd.f32 %v4955_v34, %v1855_v50  ;;  %v2432_v16 = vadd.f32 %v4955_v34, %v1856_v56  ;;  %2573 = vst [vmem:[%s4451_s13 + $0x318] sm:$0xff] %v2380_v55  ;;  %v759_v60 = vpop.f32.mrb[69].mxu0  ;;  %v1182_v46 = vpop.f32.mrb[69].mxu1  ;;  %v5431_v18 = vld [vmem:[#allocation47_spill] sm:$0xff]  ;;  %v5432_v55 = vld [vmem:[#allocation33_spill] sm:$0xff] }
 0x19e   : > { %2581 = vst.msk [vmem:[%s4451_s13 + $0x358] sm:$0xff] %vm2475_vm1, %v2388_v9  ;;  %2627 = vst [vmem:[%s4451_s13 + $0x4c8] sm:$0xff] %v2434_v6  ;;  %v1807_v61 = vmul.f32 %v5422_v52, %v757_v58  ;;  %v1818_v35 = vmul.f32 %v3001_v51, %v5426_v39  ;;  %v1861_v14 = vmul.f32 %v5428_v0, %v5427_v38  ;;  %v5433_v6 = vld [vmem:[#allocation48_spill] sm:$0xff]  ;;  %v5435_v58 = vld [vmem:[#allocation43_spill] sm:$0xff] }
 0x19f   : > { %2628 = vst [vmem:[%s4451_s13 + $0x4d0] sm:$0xff] %v2435_v28  ;;  %v1862_v4 = vmul.f32 %v5428_v0, %v5429_v57  ;;  %2574 = vst [vmem:[%s4451_s13 + $0x320] sm:$0xff] %v2381_v27  ;;  %v1808_v21 = vmul.f32 %v5422_v52, %v759_v60  ;;  %v1815_v47 = vmul.f32 %v5430_v44, %v1182_v46  ;;  %v4987_v15 = vpop.permute.xlu1 %2228  ;;  %v4989_v22 = vpop.permute.xlu0 %2223  ;;  %v5434_v27 = vld [vmem:[#allocation11_spill] sm:$0xff]  ;;  %v5436_v51 = vld [vmem:[#allocation34_spill] sm:$0xff] }
 0x1a0   : > { %2578 = vst.msk [vmem:[%s4451_s13 + $0x340] sm:$0xff] %vm2475_vm1, %v2385_v42  ;;  %2624 = vst [vmem:[%s4451_s13 + $0x4b0] sm:$0xff] %v2431_v53  ;;  %v2383_v62 = vadd.f32 %v4787_v31, %v1807_v61  ;;  %v2394_v32 = vadd.f32 %v4803_v8, %v1818_v35  ;;  %v2440_v3 = vadd.f32 %v4987_v15, %v1864_v1  ;;  %v763_v5 = vpop.f32.mrb[70].mxu0  ;;  %v3004_v52 = vpop.f32.mrb[70].mxu1  ;;  %v5437_v1 = vld [vmem:[#allocation44_spill] sm:$0xff] }
 0x1a1   : > { %2625 = vst [vmem:[%s4451_s13 + $0x4b8] sm:$0xff] %v2432_v16  ;;  %v2441_v54 = vadd.f32 %v4987_v15, %v1865_v63  ;;  %v2384_v43 = vadd.f32 %v4787_v31, %v1808_v21  ;;  %v2391_v50 = vadd.f32 %v4805_v2, %v1815_v47  ;;  %v2437_v7 = vadd.f32 %v4989_v22, %v1861_v14  ;;  %v765_v53 = vpop.f32.mrb[71].mxu0  ;;  %v1192_v16 = vpop.f32.mrb[71].mxu1  ;;  %v5438_v61 = vld [vmem:[#allocation12_spill] sm:$0xff] }
 0x1a2   : > { %v2438_v56 = vadd.f32 %v4989_v22, %v1862_v4  ;;  %v1870_v9 = vmul.f32 %v5432_v55, %v5431_v18  ;;  %v1871_v28 = vmul.f32 %v5432_v55, %v5433_v6  ;;  %2576 = vst [vmem:[%s4451_s13 + $0x330] sm:$0xff] %v2383_v62  ;;  %2587 = vst.msk [vmem:[%s4451_s13 + $0x388] sm:$0xff] %vm2475_vm1, %v2394_v32  ;;  %v5443_v6 = vld [vmem:[#allocation51_spill] sm:$0xff] }
 0x1a3   : > { %2633 = vst [vmem:[%s4451_s13 + $0x4f8] sm:$0xff] %v2440_v3  ;;  %2634 = vst [vmem:[%s4451_s13 + $0x500] sm:$0xff] %v2441_v54  ;;  %v1810_v31 = vmul.f32 %v5418_v33, %v763_v5  ;;  %v1824_v42 = vmul.f32 %v3004_v52, %v5434_v27  ;;  %v1867_v17 = vmul.f32 %v5436_v51, %v5435_v58  ;;  %v5021_v60 = vpop.permute.xlu1 %2238  ;;  %v5023_v46 = vpop.permute.xlu0 %2233  ;;  %v5439_v54 = vld [vmem:[#allocation53_spill] sm:$0xff]  ;;  %v5446_v58 = vld [vmem:[#allocation14_spill] sm:$0xff] }
 0x1a4   : > { %v1868_v23 = vmul.f32 %v5436_v51, %v5437_v1  ;;  %2577 = vst [vmem:[%s4451_s13 + $0x338] sm:$0xff] %v2384_v43  ;;  %2584 = vst.msk [vmem:[%s4451_s13 + $0x370] sm:$0xff] %vm2475_vm1, %v2391_v50  ;;  %v1811_v63 = vmul.f32 %v5418_v33, %v765_v53  ;;  %v1821_v35 = vmul.f32 %v5438_v61, %v1192_v16  ;;  %v769_v32 = vpop.f32.mrb[72].mxu0  ;;  %v3007_v3 = vpop.f32.mrb[72].mxu1  ;;  %v5440_v43 = vld [vmem:[#allocation37_spill] sm:$0xff] }
 0x1a5   : > { %2630 = vst [vmem:[%s4451_s13 + $0x4e0] sm:$0xff] %v2437_v7  ;;  %2631 = vst [vmem:[%s4451_s13 + $0x4e8] sm:$0xff] %v2438_v56  ;;  %v2386_v38 = vadd.f32 %v4785_v37, %v1810_v31  ;;  %v2400_v14 = vadd.f32 %v4821_v49, %v1824_v42  ;;  %v2446_v57 = vadd.f32 %v5021_v60, %v1870_v9  ;;  %v5441_v7 = vld [vmem:[#allocation54_spill] sm:$0xff]  ;;  %v5442_v5 = vld [vmem:[#allocation13_spill] sm:$0xff]  ;;  %v771_v18 = vpop.f32.mrb[73].mxu0  ;;  %v1202_v9 = vpop.f32.mrb[73].mxu1 }
 0x1a6   : > { %v2447_v4 = vadd.f32 %v5021_v60, %v1871_v28  ;;  %v2387_v33 = vadd.f32 %v4785_v37, %v1811_v63  ;;  %v2397_v21 = vadd.f32 %v4823_v25, %v1821_v35  ;;  %v2443_v47 = vadd.f32 %v5023_v46, %v1867_v17  ;;  %v5444_v28 = vld [vmem:[#allocation38_spill] sm:$0xff]  ;;  %v5445_v42 = vld [vmem:[#allocation52_spill] sm:$0xff] }
 0x1a7   : > { %v2444_v62 = vadd.f32 %v5023_v46, %v1868_v23  ;;  %v1876_v50 = vmul.f32 %v5440_v43, %v5439_v54  ;;  %v1877_v56 = vmul.f32 %v5440_v43, %v5441_v7  ;;  %2579 = vst [vmem:[%s4451_s13 + $0x348] sm:$0xff] %v2386_v38  ;;  %2593 = vst.msk [vmem:[%s4451_s13 + $0x3b8] sm:$0xff] %vm2475_vm1, %v2400_v14  ;;  %v5055_v1 = vpop.permute.xlu1 %2248  ;;  %v5057_v23 = vpop.permute.xlu0 %2243  ;;  %v5449_v54 = vld [vmem:[#allocation58_spill] sm:$0xff]  ;;  %v5450_v7 = vld [vmem:[#allocation15_spill] sm:$0xff] }
 0x1a8   : > { %2639 = vst [vmem:[%s4451_s13 + $0x528] sm:$0xff] %v2446_v57  ;;  %2640 = vst [vmem:[%s4451_s13 + $0x530] sm:$0xff] %v2447_v4  ;;  %v1813_v37 = vmul.f32 %v5430_v44, %v769_v32  ;;  %v1830_v52 = vmul.f32 %v3007_v3, %v5442_v5  ;;  %v1873_v31 = vmul.f32 %v5444_v28, %v5443_v6  ;;  %v5448_v32 = vld [vmem:[#allocation41_spill] sm:$0xff] }
 0x1a9   : > { %v1874_v53 = vmul.f32 %v5444_v28, %v5445_v42  ;;  %2580 = vst [vmem:[%s4451_s13 + $0x350] sm:$0xff] %v2387_v33  ;;  %2590 = vst.msk [vmem:[%s4451_s13 + $0x3a0] sm:$0xff] %vm2475_vm1, %v2397_v21  ;;  %v1814_v16 = vmul.f32 %v5430_v44, %v771_v18  ;;  %v1827_v17 = vmul.f32 %v5446_v58, %v1202_v9  ;;  %v775_v21 = vpop.f32.mrb[74].mxu0  ;;  %v5451_v18 = vld [vmem:[#allocation55_spill] sm:$0xff]  ;;  %v5452_v9 = vld [vmem:[#allocation42_spill] sm:$0xff] }
 0x1aa   : > { %2636 = vst [vmem:[%s4451_s13 + $0x510] sm:$0xff] %v2443_v47  ;;  %2637 = vst [vmem:[%s4451_s13 + $0x518] sm:$0xff] %v2444_v62  ;;  %v2389_v63 = vadd.f32 %v4805_v2, %v1813_v37  ;;  %v2406_v35 = vadd.f32 %v4839_v11, %v1830_v52  ;;  %v2452_v38 = vadd.f32 %v5055_v1, %v1876_v50  ;;  %v3010_v47 = vpop.f32.mrb[74].mxu1  ;;  %v5447_v62 = vld [vmem:[#allocation57_spill] sm:$0xff]  ;;  %v777_v37 = vpop.f32.mrb[75].mxu0 }
 0x1ab   : > { %v2453_v14 = vadd.f32 %v5055_v1, %v1877_v56  ;;  %v2390_v44 = vadd.f32 %v4805_v2, %v1814_v16  ;;  %v2403_v57 = vadd.f32 %v4841_v19, %v1827_v17  ;;  %v2449_v4 = vadd.f32 %v5057_v23, %v1873_v31  ;;  %v1212_v52 = vpop.f32.mrb[75].mxu1  ;;  %v5453_v31 = vld [vmem:[#allocation56_spill] sm:$0xff] }
 0x1ac   : > { %v2450_v33 = vadd.f32 %v5057_v23, %v1874_v53  ;;  %v1882_v3 = vmul.f32 %v5448_v32, %v5447_v62  ;;  %v1883_v50 = vmul.f32 %v5448_v32, %v5449_v54  ;;  %2582 = vst [vmem:[%s4451_s13 + $0x360] sm:$0xff] %v2389_v63  ;;  %2599 = vst.msk [vmem:[%s4451_s13 + $0x3e8] sm:$0xff] %vm2475_vm1, %v2406_v35  ;;  %v5454_v16 = vld [vmem:[#allocation16_spill] sm:$0xff]  ;;  %v5089_v63 = vpop.permute.xlu1 %2258  ;;  %v5091_v35 = vpop.permute.xlu0 %2253  ;;  %v5455_v54 = vld [vmem:[#allocation61_spill] sm:$0xff] }
 0x1ad   : > { %2645 = vst [vmem:[%s4451_s13 + $0x558] sm:$0xff] %v2452_v38  ;;  %2646 = vst [vmem:[%s4451_s13 + $0x560] sm:$0xff] %v2453_v14  ;;  %v1816_v2 = vmul.f32 %v5426_v39, %v775_v21  ;;  %v1836_v56 = vmul.f32 %v3010_v47, %v5450_v7  ;;  %v1879_v6 = vmul.f32 %v5452_v9, %v5451_v18  ;;  %v781_v47 = vpop.f32.mrb[76].mxu0  ;;  %v3013_v62 = vpop.f32.mrb[76].mxu1 }
 0x1ae   : > { %v1880_v42 = vmul.f32 %v5452_v9, %v5453_v31  ;;  %2583 = vst [vmem:[%s4451_s13 + $0x368] sm:$0xff] %v2390_v44  ;;  %2596 = vst.msk [vmem:[%s4451_s13 + $0x3d0] sm:$0xff] %vm2475_vm1, %v2403_v57  ;;  %v1817_v53 = vmul.f32 %v5426_v39, %v777_v37  ;;  %v1833_v17 = vmul.f32 %v5454_v16, %v1212_v52  ;;  %v5458_v37 = vld [vmem:[#allocation17_spill] sm:$0xff]  ;;  %v783_v18 = vpop.f32.mrb[77].mxu0  ;;  %v5459_v31 = vld [vmem:[#allocation59_spill] sm:$0xff] }
 0x1af   : > { %2642 = vst [vmem:[%s4451_s13 + $0x540] sm:$0xff] %v2449_v4  ;;  %2643 = vst [vmem:[%s4451_s13 + $0x548] sm:$0xff] %v2450_v33  ;;  %v2392_v38 = vadd.f32 %v4803_v8, %v1816_v2  ;;  %v2412_v14 = vadd.f32 %v4857_v26, %v1836_v56  ;;  %v2458_v44 = vadd.f32 %v5089_v63, %v1882_v3  ;;  %v5456_v2 = vld [vmem:[#allocation45_spill] sm:$0xff]  ;;  %v5457_v3 = vld [vmem:[#allocation62_spill] sm:$0xff] }
 0x1b0   : > { %v2459_v57 = vadd.f32 %v5089_v63, %v1883_v50  ;;  %v2393_v39 = vadd.f32 %v4803_v8, %v1817_v53  ;;  %v2409_v4 = vadd.f32 %v4859_v13, %v1833_v17  ;;  %v2455_v33 = vadd.f32 %v5091_v35, %v1879_v6  ;;  %v1222_v6 = vpop.f32.mrb[77].mxu1  ;;  %v5461_v17 = vld [vmem:[#allocation60_spill] sm:$0xff] }
 0x1b1   : > { %v2456_v21 = vadd.f32 %v5091_v35, %v1880_v42  ;;  %v1888_v56 = vmul.f32 %v5456_v2, %v5455_v54  ;;  %v1889_v50 = vmul.f32 %v5456_v2, %v5457_v3  ;;  %2585 = vst [vmem:[%s4451_s13 + $0x378] sm:$0xff] %v2392_v38  ;;  %2605 = vst.msk [vmem:[%s4451_s13 + $0x418] sm:$0xff] %vm2475_vm1, %v2412_v14  ;;  %v5460_v42 = vld [vmem:[#allocation46_spill] sm:$0xff]  ;;  %v5471_v2 = vld [vmem:[#allocation64_spill] sm:$0xff] }
 0x1b2   : > { %2651 = vst [vmem:[%s4451_s13 + $0x588] sm:$0xff] %v2458_v44  ;;  %2652 = vst [vmem:[%s4451_s13 + $0x590] sm:$0xff] %v2459_v57  ;;  %v1819_v8 = vmul.f32 %v5438_v61, %v781_v47  ;;  %v1842_v52 = vmul.f32 %v3013_v62, %v5458_v37  ;;  %v1885_v53 = vmul.f32 %v5460_v42, %v5459_v31  ;;  %v5462_v14 = vld [vmem:[#allocation18_spill] sm:$0xff]  ;;  %v5123_v57 = vpop.permute.xlu1 %2268  ;;  %v5125_v47 = vpop.permute.xlu0 %2263 }
 0x1b3   : > { %v1886_v54 = vmul.f32 %v5460_v42, %v5461_v17  ;;  %2586 = vst [vmem:[%s4451_s13 + $0x380] sm:$0xff] %v2393_v39  ;;  %2602 = vst.msk [vmem:[%s4451_s13 + $0x400] sm:$0xff] %vm2475_vm1, %v2409_v4  ;;  %v1820_v38 = vmul.f32 %v5438_v61, %v783_v18  ;;  %v1839_v44 = vmul.f32 %v5462_v14, %v1222_v6  ;;  %v787_v6 = vpop.f32.mrb[78].mxu0  ;;  %v3016_v31 = vpop.f32.mrb[78].mxu1  ;;  %v5466_v17 = vld [vmem:[#allocation49_spill] sm:$0xff] }
 0x1b4   : > { %2648 = vst [vmem:[%s4451_s13 + $0x570] sm:$0xff] %v2455_v33  ;;  %2649 = vst [vmem:[%s4451_s13 + $0x578] sm:$0xff] %v2456_v21  ;;  %v2395_v62 = vadd.f32 %v4823_v25, %v1819_v8  ;;  %v2418_v39 = vadd.f32 %v4875_v48, %v1842_v52  ;;  %v2464_v4 = vadd.f32 %v5123_v57, %v1888_v56  ;;  %v5465_v8 = vld [vmem:[#allocation65_spill] sm:$0xff]  ;;  %v5467_v56 = vld [vmem:[#allocation66_spill] sm:$0xff] }
 0x1b5   : > { %5463 = vst [vmem:[#allocation24_spill] sm:$0xff] %v5123_v57  ;;  %5464 = vst [vmem:[#allocation6_spill] sm:$0xff] %v5125_v47  ;;  %v2465_v33 = vadd.f32 %v5123_v57, %v1889_v50  ;;  %v2396_v61 = vadd.f32 %v4823_v25, %v1820_v38  ;;  %v2415_v21 = vadd.f32 %v4877_v45, %v1839_v44  ;;  %v789_v38 = vpop.f32.mrb[79].mxu0  ;;  %v1232_v44 = vpop.f32.mrb[79].mxu1  ;;  %v5470_v57 = vld [vmem:[#allocation50_spill] sm:$0xff] }
 0x1b6   : > { %v2461_v3 = vadd.f32 %v5125_v47, %v1885_v53  ;;  %v2462_v18 = vadd.f32 %v5125_v47, %v1886_v54  ;;  %v1894_v52 = vmul.f32 %v5466_v17, %v5465_v8  ;;  %v1895_v50 = vmul.f32 %v5466_v17, %v5467_v56  ;;  %2588 = vst [vmem:[%s4451_s13 + $0x390] sm:$0xff] %v2395_v62  ;;  %v5468_v53 = vld [vmem:[#allocation19_spill] sm:$0xff]  ;;  %v793_v56 = vpop.f32.mrb[80].mxu0 }
 0x1b7   : > { %2611 = vst.msk [vmem:[%s4451_s13 + $0x448] sm:$0xff] %vm2475_vm1, %v2418_v39  ;;  %2657 = vst [vmem:[%s4451_s13 + $0x5b8] sm:$0xff] %v2464_v4  ;;  %v1822_v25 = vmul.f32 %v5434_v27, %v787_v6  ;;  %v1848_v54 = vmul.f32 %v3016_v31, %v5468_v53  ;;  %v5469_v47 = vld [vmem:[#allocation63_spill] sm:$0xff]  ;;  %v1892_v8 = vmul.f32 %v5470_v57, %v5471_v2  ;;  %v5472_v39 = vld [vmem:[#allocation20_spill] sm:$0xff]  ;;  %v5159_v6 = vpop.permute.xlu0 %2273 }
 0x1b8   : > { %2658 = vst [vmem:[%s4451_s13 + $0x5c0] sm:$0xff] %v2465_v33  ;;  %v1891_v42 = vmul.f32 %v5470_v57, %v5469_v47  ;;  %2589 = vst [vmem:[%s4451_s13 + $0x398] sm:$0xff] %v2396_v61  ;;  %v1823_v62 = vmul.f32 %v5434_v27, %v789_v38  ;;  %v1845_v4 = vmul.f32 %v5472_v39, %v1232_v44  ;;  %v5157_v33 = vpop.permute.xlu1 %2278 }
 0x1b9   : > { %2608 = vst.msk [vmem:[%s4451_s13 + $0x430] sm:$0xff] %vm2475_vm1, %v2415_v21  ;;  %2654 = vst [vmem:[%s4451_s13 + $0x5a0] sm:$0xff] %v2461_v3  ;;  %v2398_v47 = vadd.f32 %v4821_v49, %v1822_v25  ;;  %v2424_v2 = vadd.f32 %v4893_v12, %v1848_v54  ;;  %v2470_v61 = vadd.f32 %v5157_v33, %v1894_v52  ;;  %v3019_v25 = vpop.f32.mrb[80].mxu1 }
 0x1ba   : > { %2655 = vst [vmem:[%s4451_s13 + $0x5a8] sm:$0xff] %v2462_v18  ;;  %v2471_v21 = vadd.f32 %v5157_v33, %v1895_v50  ;;  %v2399_v27 = vadd.f32 %v4821_v49, %v1823_v62  ;;  %v2421_v3 = vadd.f32 %v4895_v29, %v1845_v4  ;;  %v2467_v18 = vadd.f32 %v5159_v6, %v1891_v42  ;;  %v795_v50 = vpop.f32.mrb[81].mxu0  ;;  %v1242_v54 = vpop.f32.mrb[81].mxu1 }
 0x1bb   : > { %v2468_v31 = vadd.f32 %v5159_v6, %v1892_v8  ;;  %2591 = vst [vmem:[%s4451_s13 + $0x3a8] sm:$0xff] %v2398_v47  ;;  %2617 = vst.msk [vmem:[%s4451_s13 + $0x478] sm:$0xff] %vm2475_vm1, %v2424_v2  ;;  %v1825_v52 = vmul.f32 %v5446_v58, %v793_v56  ;;  %v1854_v49 = vmul.f32 %v3019_v25, %v4300_v20  ;;  %v799_v4 = vpop.f32.mrb[82].mxu0  ;;  %v3022_v47 = vpop.f32.mrb[82].mxu1 }
 0x1bc   : > { %2663 = vst [vmem:[%s4451_s13 + $0x5e8] sm:$0xff] %v2470_v61  ;;  %2664 = vst [vmem:[%s4451_s13 + $0x5f0] sm:$0xff] %v2471_v21  ;;  %v1826_v42 = vmul.f32 %v5446_v58, %v795_v50  ;;  %v1851_v38 = vmul.f32 %v5413_v36, %v1242_v54  ;;  %v1828_v2 = vmul.f32 %v5442_v5, %v799_v4  ;;  %v801_v36 = vpop.f32.mrb[83].mxu0  ;;  %v1252_v61 = vpop.f32.mrb[83].mxu1 }
 0x1bd   : > { %2592 = vst [vmem:[%s4451_s13 + $0x3b0] sm:$0xff] %v2399_v27  ;;  %2614 = vst.msk [vmem:[%s4451_s13 + $0x460] sm:$0xff] %vm2475_vm1, %v2421_v3  ;;  %v2401_v44 = vadd.f32 %v4841_v19, %v1825_v52  ;;  %v2430_v8 = vadd.f32 %v4919_v59, %v1854_v49  ;;  %v1860_v58 = vmul.f32 %v3022_v47, %v5416_v10  ;;  %v805_v10 = vpop.f32.mrb[84].mxu0 }
 0x1be   : > { %2660 = vst [vmem:[%s4451_s13 + $0x5d0] sm:$0xff] %v2467_v18  ;;  %2661 = vst [vmem:[%s4451_s13 + $0x5d8] sm:$0xff] %v2468_v31  ;;  %v2402_v20 = vadd.f32 %v4841_v19, %v1826_v42  ;;  %v2427_v62 = vadd.f32 %v4921_v41, %v1851_v38  ;;  %v1829_v19 = vmul.f32 %v5442_v5, %v801_v36  ;;  %v3025_v18 = vpop.f32.mrb[84].mxu1 }
 0x1bf   : > { %2594 = vst [vmem:[%s4451_s13 + $0x3c0] sm:$0xff] %v2401_v44  ;;  %2623 = vst.msk [vmem:[%s4451_s13 + $0x4a8] sm:$0xff] %vm2475_vm1, %v2430_v8  ;;  %v1857_v59 = vmul.f32 %v5420_v24, %v1252_v61  ;;  %v2404_v41 = vadd.f32 %v4839_v11, %v1828_v2  ;;  %v2436_v21 = vadd.f32 %v4953_v30, %v1860_v58  ;;  %v807_v24 = vpop.f32.mrb[85].mxu0  ;;  %v1262_v56 = vpop.f32.mrb[85].mxu1 }
 0x1c0   : > { %2595 = vst [vmem:[%s4451_s13 + $0x3c8] sm:$0xff] %v2402_v20  ;;  %2620 = vst.msk [vmem:[%s4451_s13 + $0x490] sm:$0xff] %vm2475_vm1, %v2427_v62  ;;  %v2405_v27 = vadd.f32 %v4839_v11, %v1829_v19  ;;  %v1831_v31 = vmul.f32 %v5454_v16, %v805_v10  ;;  %v1866_v5 = vmul.f32 %v3025_v18, %v5424_v40  ;;  %v811_v40 = vpop.f32.mrb[86].mxu0  ;;  %v3028_v50 = vpop.f32.mrb[86].mxu1 }
 0x1c1   : > { %v2433_v3 = vadd.f32 %v4955_v34, %v1857_v59  ;;  %2597 = vst [vmem:[%s4451_s13 + $0x3d8] sm:$0xff] %v2404_v41  ;;  %2629 = vst.msk [vmem:[%s4451_s13 + $0x4d8] sm:$0xff] %vm2475_vm1, %v2436_v21  ;;  %v1832_v11 = vmul.f32 %v5454_v16, %v807_v24  ;;  %v1863_v30 = vmul.f32 %v5428_v0, %v1262_v56  ;;  %v813_v0 = vpop.f32.mrb[87].mxu0  ;;  %v1272_v42 = vpop.f32.mrb[87].mxu1 }
 0x1c2   : > { %2598 = vst [vmem:[%s4451_s13 + $0x3e0] sm:$0xff] %v2405_v27  ;;  %v2407_v34 = vadd.f32 %v4859_v13, %v1831_v31  ;;  %v2442_v25 = vadd.f32 %v4987_v15, %v1866_v5  ;;  %v1834_v54 = vmul.f32 %v5450_v7, %v811_v40  ;;  %v1872_v16 = vmul.f32 %v3028_v50, %v5432_v55  ;;  %v5475_v5 = vld [vmem:[#allocation24_spill] sm:$0xff] }
 0x1c3   : > { %2626 = vst.msk [vmem:[%s4451_s13 + $0x4c0] sm:$0xff] %vm2475_vm1, %v2433_v3  ;;  %v2408_v52 = vadd.f32 %v4859_v13, %v1832_v11  ;;  %v2439_v49 = vadd.f32 %v4989_v22, %v1863_v30  ;;  %v1835_v13 = vmul.f32 %v5450_v7, %v813_v0  ;;  %v1869_v15 = vmul.f32 %v5436_v51, %v1272_v42  ;;  %v5476_v11 = vld [vmem:[#allocation6_spill] sm:$0xff] }
 0x1c4   : > { %2600 = vst [vmem:[%s4451_s13 + $0x3f0] sm:$0xff] %v2407_v34  ;;  %2635 = vst.msk [vmem:[%s4451_s13 + $0x508] sm:$0xff] %vm2475_vm1, %v2442_v25  ;;  %v2410_v22 = vadd.f32 %v4857_v26, %v1834_v54  ;;  %v2448_v38 = vadd.f32 %v5021_v60, %v1872_v16  ;;  %v817_v55 = vpop.f32.mrb[88].mxu0  ;;  %v3031_v20 = vpop.f32.mrb[88].mxu1 }
 0x1c5   : > { %2601 = vst [vmem:[%s4451_s13 + $0x3f8] sm:$0xff] %v2408_v52  ;;  %2632 = vst.msk [vmem:[%s4451_s13 + $0x4f0] sm:$0xff] %vm2475_vm1, %v2439_v49  ;;  %v2411_v44 = vadd.f32 %v4857_v26, %v1835_v13  ;;  %v2445_v8 = vadd.f32 %v5023_v46, %v1869_v15  ;;  %v1837_v62 = vmul.f32 %v5462_v14, %v817_v55  ;;  %v819_v51 = vpop.f32.mrb[89].mxu0  ;;  %v1282_v4 = vpop.f32.mrb[89].mxu1 }
 0x1c6   : > { %2603 = vst [vmem:[%s4451_s13 + $0x408] sm:$0xff] %v2410_v22  ;;  %2641 = vst.msk [vmem:[%s4451_s13 + $0x538] sm:$0xff] %vm2475_vm1, %v2448_v38  ;;  %v1878_v7 = vmul.f32 %v3031_v20, %v5440_v43  ;;  %v1838_v26 = vmul.f32 %v5462_v14, %v819_v51  ;;  %v1875_v60 = vmul.f32 %v5444_v28, %v1282_v4 }
 0x1c7   : > { %2604 = vst [vmem:[%s4451_s13 + $0x410] sm:$0xff] %v2411_v44  ;;  %2638 = vst.msk [vmem:[%s4451_s13 + $0x520] sm:$0xff] %vm2475_vm1, %v2445_v8  ;;  %v2413_v46 = vadd.f32 %v4877_v45, %v1837_v62 }
 0x1c8   : > { %v2454_v47 = vadd.f32 %v5055_v1, %v1878_v7  ;;  %v2414_v2 = vadd.f32 %v4877_v45, %v1838_v26  ;;  %v2451_v58 = vadd.f32 %v5057_v23, %v1875_v60  ;;  %v823_v43 = vpop.f32.mrb[90].mxu0  ;;  %v3034_v36 = vpop.f32.mrb[90].mxu1 }
 0x1c9   : > { %2606 = vst [vmem:[%s4451_s13 + $0x420] sm:$0xff] %v2413_v46  ;;  %v1840_v61 = vmul.f32 %v5458_v37, %v823_v43  ;;  %v1884_v14 = vmul.f32 %v3034_v36, %v5448_v32  ;;  %v825_v28 = vpop.f32.mrb[91].mxu0  ;;  %v1292_v19 = vpop.f32.mrb[91].mxu1 }
 0x1ca   : > { %2647 = vst.msk [vmem:[%s4451_s13 + $0x568] sm:$0xff] %vm2475_vm1, %v2454_v47  ;;  %2607 = vst [vmem:[%s4451_s13 + $0x428] sm:$0xff] %v2414_v2  ;;  %v1841_v45 = vmul.f32 %v5458_v37, %v825_v28  ;;  %v1881_v1 = vmul.f32 %v5452_v9, %v1292_v19  ;;  %v5473_v37 = vld [vmem:[#allocation45_spill] sm:$0xff] }
 0x1cb   : > { %2644 = vst.msk [vmem:[%s4451_s13 + $0x550] sm:$0xff] %vm2475_vm1, %v2451_v58  ;;  %v2416_v23 = vadd.f32 %v4875_v48, %v1840_v61  ;;  %v2460_v59 = vadd.f32 %v5089_v63, %v1884_v14  ;;  %v5474_v63 = vld [vmem:[#allocation46_spill] sm:$0xff] }
 0x1cc   : > { %v2417_v41 = vadd.f32 %v4875_v48, %v1841_v45  ;;  %v2457_v21 = vadd.f32 %v5091_v35, %v1881_v1  ;;  %v829_v32 = vpop.f32.mrb[92].mxu0  ;;  %v3037_v27 = vpop.f32.mrb[92].mxu1 }
 0x1cd   : > { %2609 = vst [vmem:[%s4451_s13 + $0x438] sm:$0xff] %v2416_v23  ;;  %2653 = vst.msk [vmem:[%s4451_s13 + $0x598] sm:$0xff] %vm2475_vm1, %v2460_v59  ;;  %v1843_v3 = vmul.f32 %v5472_v39, %v829_v32  ;;  %v1890_v10 = vmul.f32 %v3037_v27, %v5473_v37  ;;  %v831_v9 = vpop.f32.mrb[93].mxu0  ;;  %v1302_v18 = vpop.f32.mrb[93].mxu1 }
 0x1ce   : > { %2610 = vst [vmem:[%s4451_s13 + $0x440] sm:$0xff] %v2417_v41  ;;  %2650 = vst.msk [vmem:[%s4451_s13 + $0x580] sm:$0xff] %vm2475_vm1, %v2457_v21  ;;  %v1844_v48 = vmul.f32 %v5472_v39, %v831_v9  ;;  %v1887_v35 = vmul.f32 %v5474_v63, %v1302_v18 }
 0x1cf   : > { %v2419_v31 = vadd.f32 %v4895_v29, %v1843_v3  ;;  %v2466_v24 = vadd.f32 %v5475_v5, %v1890_v10 }
 0x1d0   : > { %v2420_v56 = vadd.f32 %v4895_v29, %v1844_v48  ;;  %v2463_v30 = vadd.f32 %v5476_v11, %v1887_v35  ;;  %v835_v34 = vpop.f32.mrb[94].mxu0  ;;  %v3040_v25 = vpop.f32.mrb[94].mxu1 }
 0x1d1   : > { %2612 = vst [vmem:[%s4451_s13 + $0x450] sm:$0xff] %v2419_v31  ;;  %2659 = vst.msk [vmem:[%s4451_s13 + $0x5c8] sm:$0xff] %vm2475_vm1, %v2466_v24  ;;  %v1846_v39 = vmul.f32 %v5468_v53, %v835_v34  ;;  %v1896_v52 = vmul.f32 %v3040_v25, %v5466_v17  ;;  %v837_v49 = vpop.f32.mrb[95].mxu0  ;;  %v1312_v40 = vpop.f32.mrb[95].mxu1 }
 0x1d2   : > { %2613 = vst [vmem:[%s4451_s13 + $0x458] sm:$0xff] %v2420_v56  ;;  %2656 = vst.msk [vmem:[%s4451_s13 + $0x5b0] sm:$0xff] %vm2475_vm1, %v2463_v30  ;;  %v1847_v29 = vmul.f32 %v5468_v53, %v837_v49  ;;  %v1893_v50 = vmul.f32 %v5470_v57, %v1312_v40 }
 0x1d3   : > { %v2422_v54 = vadd.f32 %v4893_v12, %v1846_v39  ;;  %v2472_v16 = vadd.f32 %v5157_v33, %v1896_v52 }
 0x1d4   : > { %v2423_v0 = vadd.f32 %v4893_v12, %v1847_v29  ;;  %v2469_v42 = vadd.f32 %v5159_v6, %v1893_v50 }
 0x1d5   : > { %2615 = vst [vmem:[%s4451_s13 + $0x468] sm:$0xff] %v2422_v54  ;;  %2665 = vst.msk [vmem:[%s4451_s13 + $0x5f8] sm:$0xff] %vm2475_vm1, %v2472_v16 }
 0x1d6   : > { %2616 = vst [vmem:[%s4451_s13 + $0x470] sm:$0xff] %v2423_v0  ;;  %2662 = vst.msk [vmem:[%s4451_s13 + $0x5e0] sm:$0xff] %vm2475_vm1, %v2469_v42 }
 0x1d7 PF: > { %p14_p8 = scmp.ge.s32.totalorder %s3228_s20, 4   ;;  %s5477_s15 = smov %s3166_s16 }
 0x1d8   : > { %s5478_s16 = smov %s3170_s17  ;;  %s5479_s17 = smov %s3238_s23 }
 0x1d9   : > { %s5480_s18 = smov %s3228_s20  ;;  %16 = sbr.rel (!%p14_p8) target bundleno = 3 (0x3), region = 76 }
 0x1e0   :  { %2687 = vsyncpa [#allocation3], 1 }
 0x1e1   :  { %2689 = vsyncpa [#allocation3 + $0x1], 1 }

</bundles_post_ra>
